<compile_context>
chip_gen: v5e
topology: v5e:2x2
jax: 0.10.0
libtpu: 0.0.40
codegen_flags: <defaults>
</compile_context>

<pallas_src>
import math
import functools

import jax
import jax.numpy as jnp
from jax.experimental import pallas as pl
from jax.experimental.pallas import tpu as pltpu


def _mha_class_kernel(x_full_ref, x_q_ref, w_in_ref, b_in_ref,
                      wq_ref, wkv_ref, w_op_ref, b_proj_ref,
                      gamma_ref, beta_ref,
                      out_ref, attn_w_ref,
                      *, num_heads: int, head_dim: int, q_block: int,
                      has_input_proj: bool, eps: float):
    """Grid = (batch, q_block index).

    x_full_ref : (1, S, d_in)            full sequence (for K/V)
    x_q_ref    : (1, Tq, d_in)           this q tile (for Q / residual / LN)
    w_in_ref   : (d_in, d_model) bf16    input_proj weight^T   (dummy (1,1) if Identity)
    b_in_ref   : (1, d_model)    f32     input_proj bias       (dummy (1,1) if Identity)
    wq_ref     : (d_model, d_model) bf16 Wq^T with softmax scale folded in
    wkv_ref    : (d_model, 2*d_model) bf16  [Wk^T | Wv^T]
    w_op_ref   : (H, head_dim, d_model) bf16  (Wo^T @ Wproj^T) split per head
    b_proj_ref : (1, d_model)    f32
    gamma/beta : (1, d_model)    f32     LayerNorm affine
    out_ref    : (1, Tq, d_model)
    attn_w_ref : (1, Tq, S)              head-averaged attention weights
    """
    qi = pl.program_id(1)
    d_model = num_heads * head_dim
    seq_len = x_full_ref.shape[1]

    # ---- input projection (skipped for nn.Identity) ------------------------
    if has_input_proj:
        w_in = w_in_ref[...]
        b_in = b_in_ref[0]
        h_kv = jnp.dot(x_full_ref[0].astype(jnp.bfloat16), w_in,
                       preferred_element_type=jnp.float32) + b_in      # (S, d_model) f32
        h_q = jnp.dot(x_q_ref[0].astype(jnp.bfloat16), w_in,
                      preferred_element_type=jnp.float32) + b_in       # (Tq, d_model) f32
    else:
        h_kv = x_full_ref[0].astype(jnp.float32)
        h_q = x_q_ref[0].astype(jnp.float32)

    h_kv_b = h_kv.astype(jnp.bfloat16)
    h_q_b = h_q.astype(jnp.bfloat16)

    # ---- Q (tile rows only) and combined K|V projection, all lane-wide -----
    q_all = jnp.dot(h_q_b, wq_ref[...],
                    preferred_element_type=jnp.float32).astype(jnp.bfloat16)   # (Tq, d_model)
    kv = jnp.dot(h_kv_b, wkv_ref[...],
                 preferred_element_type=jnp.float32)                           # (S, 2*d_model)
    k_all = kv[:, :d_model].astype(jnp.bfloat16)                               # aligned slice
    v_all = kv[:, d_model:].astype(jnp.bfloat16)

    # ---- causal additive bias for this q tile (shared across heads) --------
    row = jax.lax.broadcasted_iota(jnp.int32, (q_block, seq_len), 0) + qi * q_block
    col = jax.lax.broadcasted_iota(jnp.int32, (q_block, seq_len), 1)
    mask_bias = jnp.where(col > row, jnp.float32(-1e30), jnp.float32(0.0))     # (Tq, S)

    acc = jnp.zeros((q_block, d_model), jnp.float32)      # fused out_proj∘proj accumulator
    p_sum = jnp.zeros((q_block, seq_len), jnp.float32)    # head-summed attention probs

    for hh in range(num_heads):
        lo = hh * head_dim
        q_h = q_all[:, lo:lo + head_dim]                  # (Tq, hd)  bf16
        k_h = k_all[:, lo:lo + head_dim]                  # (S,  hd)  bf16
        v_h = v_all[:, lo:lo + head_dim]                  # (S,  hd)  bf16

        s = jax.lax.dot_general(q_h, k_h, (((1,), (1,)), ((), ())),
                                preferred_element_type=jnp.float32)            # (Tq, S)
        s = s + mask_bias

        m = jnp.max(s, axis=-1, keepdims=True)
        e = jnp.exp(s - m)
        inv = 1.0 / jnp.sum(e, axis=-1, keepdims=True)    # exact normalization (parity with torch)
        p = e * inv                                       # (Tq, S) f32

        ctx = jnp.dot(p.astype(jnp.bfloat16), v_h,
                      preferred_element_type=jnp.float32)                      # (Tq, hd)
        acc = acc + jnp.dot(ctx.astype(jnp.bfloat16), w_op_ref[hh],
                            preferred_element_type=jnp.float32)                # (Tq, d_model)
        p_sum = p_sum + p

    # ---- fused (out_proj -> proj) bias, residual, LayerNorm -----------------
    res = acc + b_proj_ref[0] + h_q                        # residual uses post-input_proj x
    mu = jnp.mean(res, axis=-1, keepdims=True)
    cen = res - mu
    var = jnp.mean(cen * cen, axis=-1, keepdims=True)
    y = cen * jax.lax.rsqrt(var + eps)
    y = y * gamma_ref[0] + beta_ref[0]

    out_ref[0] = y.astype(out_ref.dtype)
    attn_w_ref[0] = (p_sum * (1.0 / num_heads)).astype(attn_w_ref.dtype)


def _pick_q_block(seq_len: int, target: int = 256) -> int:
    """Largest q tile <= target that divides seq_len (multiple of 8), else full S."""
    if seq_len <= target:
        return seq_len
    for cand in range(target, 7, -1):
        if seq_len % cand == 0 and cand % 8 == 0:
            return cand
    return seq_len


def mha_pytorch_class_forward(x, w_in, b_in, in_proj_weight, out_proj_weight,
                              w_proj, b_proj, ln_gamma, ln_beta,
                              *, num_heads: int, eps: float = 1e-5,
                              q_block_target: int = 256):
    """Forward of MHAPyTorchClass (eval, key_padding_mask=None, need_weights=True).

    x               : (B, S, d_in) f32
    w_in, b_in      : input_proj Linear (torch layout (d_out, d_in)), or None for Identity
    in_proj_weight  : (3*d_out, d_out) torch MultiheadAttention in_proj (no bias)
    out_proj_weight : (d_out, d_out) torch MultiheadAttention out_proj (no bias)
    w_proj, b_proj  : self.proj Linear (torch layout)
    ln_gamma, ln_beta : LayerNorm affine params
    Returns (output (B,S,d_out), attn_weights (B,S,S) averaged over heads).
    """
    batch, seq_len, d_in = x.shape
    d_model = out_proj_weight.shape[0]
    head_dim = d_model // num_heads
    scale = 1.0 / math.sqrt(head_dim)

    q_block = _pick_q_block(seq_len, q_block_target)
    num_q_blocks = seq_len // q_block

    has_input_proj = w_in is not None
    if has_input_proj:
        w_in_b = jnp.asarray(w_in).T.astype(jnp.bfloat16)            # (d_in, d_model)
        b_in_2d = jnp.asarray(b_in).reshape(1, d_model).astype(jnp.float32)
    else:
        # nn.Identity: no weights shipped, no matmul executed (static flag in kernel).
        w_in_b = jnp.zeros((1, 1), jnp.float32)
        b_in_2d = jnp.zeros((1, 1), jnp.float32)

    # ---- host-side weight prep: pre-transpose, fold scale, compose, bf16-cast ----
    wq, wk, wv = jnp.split(jnp.asarray(in_proj_weight), 3, axis=0)   # (d_model, d_model) each
    wq_t = (wq.T * scale).astype(jnp.bfloat16)                        # scale folded into Wq
    wkv_t = jnp.concatenate([wk.T, wv.T], axis=1).astype(jnp.bfloat16)  # (d_model, 2*d_model)

    # attn_output is not a module output -> compose out_proj and proj into one matrix.
    w_op = jnp.asarray(out_proj_weight).T @ jnp.asarray(w_proj).T     # (d_model, d_model) f32
    w_op_h = w_op.reshape(num_heads, head_dim, d_model).astype(jnp.bfloat16)

    b_proj_2d = jnp.asarray(b_proj).reshape(1, d_model).astype(jnp.float32)
    gamma_2d = jnp.asarray(ln_gamma).reshape(1, d_model).astype(jnp.float32)
    beta_2d = jnp.asarray(ln_beta).reshape(1, d_model).astype(jnp.float32)

    # ---- VMEM budget per generation (v5e/v6e: 128 MiB, v7x: 64 MiB) ----
    try:
        vmem_cap = int(pltpu.get_tpu_info().vmem_capacity_bytes)
    except Exception:
        vmem_cap = 64 * 1024 * 1024
    vmem_limit = min(int(vmem_cap * 0.6), 64 * 1024 * 1024)

    kernel = functools.partial(
        _mha_class_kernel, num_heads=num_heads, head_dim=head_dim,
        q_block=q_block, has_input_proj=has_input_proj, eps=eps)

    out, attn_w = pl.pallas_call(
        kernel,
        out_shape=(
            jax.ShapeDtypeStruct((batch, seq_len, d_model), x.dtype),
            jax.ShapeDtypeStruct((batch, seq_len, seq_len), jnp.float32),
        ),
        grid_spec=pltpu.PrefetchScalarGridSpec(
            num_scalar_prefetch=0,
            grid=(batch, num_q_blocks),
            in_specs=[
                pl.BlockSpec((1, seq_len, d_in), lambda b, qi: (b, 0, 0)),     # x (full S, for K/V)
                pl.BlockSpec((1, q_block, d_in), lambda b, qi: (b, qi, 0)),    # x (q tile)
                pl.BlockSpec(w_in_b.shape, lambda b, qi: (0, 0)),              # input_proj W^T (or dummy)
                pl.BlockSpec(b_in_2d.shape, lambda b, qi: (0, 0)),             # input_proj b   (or dummy)
                pl.BlockSpec((d_model, d_model), lambda b, qi: (0, 0)),        # Wq^T (scaled)
                pl.BlockSpec((d_model, 2 * d_model), lambda b, qi: (0, 0)),    # [Wk^T | Wv^T]
                pl.BlockSpec((num_heads, head_dim, d_model), lambda b, qi: (0, 0, 0)),  # Wo^T@Wp^T per head
                pl.BlockSpec((1, d_model), lambda b, qi: (0, 0)),              # proj bias
                pl.BlockSpec((1, d_model), lambda b, qi: (0, 0)),              # LN gamma
                pl.BlockSpec((1, d_model), lambda b, qi: (0, 0)),              # LN beta
            ],
            out_specs=(
                pl.BlockSpec((1, q_block, d_model), lambda b, qi: (b, qi, 0)),
                pl.BlockSpec((1, q_block, seq_len), lambda b, qi: (b, qi, 0)),
            ),
        ),
        compiler_params=pltpu.CompilerParams(
            dimension_semantics=("parallel", "parallel"),
            vmem_limit_bytes=vmem_limit,
        ),
    )(x, x, w_in_b, b_in_2d, wq_t, wkv_t, w_op_h, b_proj_2d,
      gamma_2d, beta_2d)
    return out, attn_w


if __name__ == "__main__":
    # Small shapes consistent with the module's forward.
    # d_out is a multiple of 128 so the main output stores are lane-dense.
    batch, seq_len = 2, 8
    d_in, d_model, num_heads = 64, 128, 4
    head_dim = d_model // num_heads

    root = jax.random.PRNGKey(0)
    keys = jax.random.split(root, 9)

    def uniform(key, shape, fan_in):
        bound = 1.0 / math.sqrt(fan_in)
        return jax.random.uniform(key, shape, jnp.float32, -bound, bound)

    x = jax.random.normal(keys[0], (batch, seq_len, d_in), dtype=jnp.float32)
    w_in = uniform(keys[1], (d_model, d_in), d_in)             # input_proj.weight (torch layout)
    b_in = uniform(keys[2], (d_model,), d_in)                  # input_proj.bias
    in_proj_weight = uniform(keys[3], (3 * d_model, d_model), d_model)  # MHA in_proj (bias=False)
    out_proj_weight = uniform(keys[4], (d_model, d_model), d_model)     # MHA out_proj (bias=False)
    w_proj = uniform(keys[5], (d_model, d_model), d_model)     # self.proj.weight
    b_proj = uniform(keys[6], (d_model,), d_model)             # self.proj.bias
    ln_gamma = 1.0 + 0.1 * jax.random.normal(keys[7], (d_model,), dtype=jnp.float32)
    ln_beta = 0.1 * jax.random.normal(keys[8], (d_model,), dtype=jnp.float32)

    out, attn_w = mha_pytorch_class_forward(
        x, w_in, b_in, in_proj_weight, out_proj_weight, w_proj, b_proj,
        ln_gamma, ln_beta, num_heads=num_heads)
    out = jax.block_until_ready(out)
    attn_w = jax.block_until_ready(attn_w)

    # Pure-JAX f32 reference of the same forward pass.
    def reference(xv):
        h = jnp.einsum('bsd,od->bso', xv, w_in) + b_in                 # input_proj
        wq, wk, wv = jnp.split(in_proj_weight, 3, axis=0)

        def heads(t):
            return t.reshape(batch, seq_len, num_heads, head_dim).transpose(0, 2, 1, 3)

        q = heads(h @ wq.T) / math.sqrt(head_dim)
        k = heads(h @ wk.T)
        v = heads(h @ wv.T)
        s = jnp.einsum('bhqd,bhkd->bhqk', q, k)
        causal = jnp.triu(jnp.ones((seq_len, seq_len), dtype=bool), k=1)
        s = jnp.where(causal, -jnp.inf, s)
        p = jax.nn.softmax(s, axis=-1)
        ctx = jnp.einsum('bhqk,bhkd->bhqd', p, v)
        ctx = ctx.transpose(0, 2, 1, 3).reshape(batch, seq_len, d_model)
        attn_out = ctx @ out_proj_weight.T                             # out_proj (no bias)
        o = attn_out @ w_proj.T + b_proj                               # self.proj
        o = o + h                                                      # residual
        mu = o.mean(-1, keepdims=True)
        var = ((o - mu) ** 2).mean(-1, keepdims=True)
        o = (o - mu) / jnp.sqrt(var + 1e-5) * ln_gamma + ln_beta       # LayerNorm
        return o, p.mean(axis=1)                                       # head-averaged weights

    ref_out, ref_w = reference(x)

    assert out.shape == (batch, seq_len, d_model)
    assert attn_w.shape == (batch, seq_len, seq_len)
    # bf16 MXU operands with f32 accumulation -> tolerance loosened vs pure-f32 reference.
    err_o = float(jnp.max(jnp.abs(out - ref_out)))
    err_w = float(jnp.max(jnp.abs(attn_w - ref_w)))
    assert err_o < 5e-2, f"output max abs err {err_o}"
    assert err_w < 2e-2, f"attn weights max abs err {err_w}"

    print("KERNEL_OK")
</pallas_src>

<mosaic_0001>
module attributes {stable_mosaic.version = 11 : i64} {
  func.func @_mha_class_kernel(%arg0: i32, %arg1: i32, %arg2: memref<1x8x64xf32, #tpu.memory_space<vmem>>, %arg3: memref<1x8x64xf32, #tpu.memory_space<vmem>>, %arg4: memref<64x128xbf16, #tpu.memory_space<vmem>>, %arg5: memref<1x128xf32, #tpu.memory_space<vmem>>, %arg6: memref<128x128xbf16, #tpu.memory_space<vmem>>, %arg7: memref<128x256xbf16, #tpu.memory_space<vmem>>, %arg8: memref<4x32x128xbf16, #tpu.memory_space<vmem>>, %arg9: memref<1x128xf32, #tpu.memory_space<vmem>>, %arg10: memref<1x128xf32, #tpu.memory_space<vmem>>, %arg11: memref<1x128xf32, #tpu.memory_space<vmem>>, %arg12: memref<1x8x128xf32, #tpu.memory_space<vmem>>, %arg13: memref<1x8x8xf32, #tpu.memory_space<vmem>>) attributes {dimension_semantics = [#tpu.dimension_semantics<parallel>, #tpu.dimension_semantics<parallel>], iteration_bounds = array<i64: 2, 1>, scalar_prefetch = 0 : i64, scratch_operands = 0 : i64, tpu.core_type = #tpu.core_type<tc>, window_params = [{transform_indices = @transform_0, window_bounds = array<i64: 1, 8, 64>}, {transform_indices = @transform_1, window_bounds = array<i64: 1, 8, 64>}, {pipeline_mode = #tpu.pipeline_mode<synchronous>, transform_indices = @transform_2, window_bounds = array<i64: 64, 128>}, {pipeline_mode = #tpu.pipeline_mode<synchronous>, transform_indices = @transform_3, window_bounds = array<i64: 1, 128>}, {pipeline_mode = #tpu.pipeline_mode<synchronous>, transform_indices = @transform_4, window_bounds = array<i64: 128, 128>}, {pipeline_mode = #tpu.pipeline_mode<synchronous>, transform_indices = @transform_5, window_bounds = array<i64: 128, 256>}, {pipeline_mode = #tpu.pipeline_mode<synchronous>, transform_indices = @transform_6, window_bounds = array<i64: 4, 32, 128>}, {pipeline_mode = #tpu.pipeline_mode<synchronous>, transform_indices = @transform_7, window_bounds = array<i64: 1, 128>}, {pipeline_mode = #tpu.pipeline_mode<synchronous>, transform_indices = @transform_8, window_bounds = array<i64: 1, 128>}, {pipeline_mode = #tpu.pipeline_mode<synchronous>, transform_indices = @transform_9, window_bounds = array<i64: 1, 128>}, {transform_indices = @transform_10, window_bounds = array<i64: 1, 8, 128>}, {transform_indices = @transform_11, window_bounds = array<i64: 1, 8, 8>}]} {
    %c0 = arith.constant 0 : index
    %c0_0 = arith.constant 0 : index
    %0 = vector.load %arg4[%c0, %c0_0] : memref<64x128xbf16, #tpu.memory_space<vmem>>, vector<64x128xbf16>
    %c0_1 = arith.constant 0 : index
    %c0_2 = arith.constant 0 : index
    %1 = vector.load %arg5[%c0_1, %c0_2] : memref<1x128xf32, #tpu.memory_space<vmem>>, vector<1x128xf32>
    %2 = vector.shape_cast %1 : vector<1x128xf32> to vector<128xf32>
    %c0_3 = arith.constant 0 : index
    %c0_4 = arith.constant 0 : index
    %c0_5 = arith.constant 0 : index
    %3 = vector.load %arg2[%c0_3, %c0_4, %c0_5] : memref<1x8x64xf32, #tpu.memory_space<vmem>>, vector<1x8x64xf32>
    %4 = vector.shape_cast %3 : vector<1x8x64xf32> to vector<8x64xf32>
    %5 = arith.truncf %4 : vector<8x64xf32> to vector<8x64xbf16>
    %cst = arith.constant dense<0.000000e+00> : vector<8x128xf32>
    %6 = tpu.matmul %5, %0, %cst {dimension_numbers = #tpu.dot_dimension_numbers<[1], [0], [0], [1], [0, 0, 1, 1], [], []>} : vector<8x64xbf16>, vector<64x128xbf16>, vector<8x128xf32> -> vector<8x128xf32>
    %7 = vector.shape_cast %2 : vector<128xf32> to vector<1x128xf32>
    %8 = vector.broadcast %7 : vector<1x128xf32> to vector<8x128xf32>
    %9 = arith.addf %6, %8 : vector<8x128xf32>
    %c0_6 = arith.constant 0 : index
    %c0_7 = arith.constant 0 : index
    %c0_8 = arith.constant 0 : index
    %10 = vector.load %arg3[%c0_6, %c0_7, %c0_8] : memref<1x8x64xf32, #tpu.memory_space<vmem>>, vector<1x8x64xf32>
    %11 = vector.shape_cast %10 : vector<1x8x64xf32> to vector<8x64xf32>
    %12 = arith.truncf %11 : vector<8x64xf32> to vector<8x64xbf16>
    %cst_9 = arith.constant dense<0.000000e+00> : vector<8x128xf32>
    %13 = tpu.matmul %12, %0, %cst_9 {dimension_numbers = #tpu.dot_dimension_numbers<[1], [0], [0], [1], [0, 0, 1, 1], [], []>} : vector<8x64xbf16>, vector<64x128xbf16>, vector<8x128xf32> -> vector<8x128xf32>
    %14 = vector.shape_cast %2 : vector<128xf32> to vector<1x128xf32>
    %15 = vector.broadcast %14 : vector<1x128xf32> to vector<8x128xf32>
    %16 = arith.addf %13, %15 : vector<8x128xf32>
    %17 = arith.truncf %9 : vector<8x128xf32> to vector<8x128xbf16>
    %18 = arith.truncf %16 : vector<8x128xf32> to vector<8x128xbf16>
    %c0_10 = arith.constant 0 : index
    %c0_11 = arith.constant 0 : index
    %19 = vector.load %arg6[%c0_10, %c0_11] : memref<128x128xbf16, #tpu.memory_space<vmem>>, vector<128x128xbf16>
    %cst_12 = arith.constant dense<0.000000e+00> : vector<8x128xf32>
    %20 = tpu.matmul %18, %19, %cst_12 {dimension_numbers = #tpu.dot_dimension_numbers<[1], [0], [0], [1], [0, 0, 1, 1], [], []>} : vector<8x128xbf16>, vector<128x128xbf16>, vector<8x128xf32> -> vector<8x128xf32>
    %21 = arith.truncf %20 : vector<8x128xf32> to vector<8x128xbf16>
    %c0_13 = arith.constant 0 : index
    %c0_14 = arith.constant 0 : index
    %22 = vector.load %arg7[%c0_13, %c0_14] : memref<128x256xbf16, #tpu.memory_space<vmem>>, vector<128x256xbf16>
    %cst_15 = arith.constant dense<0.000000e+00> : vector<8x256xf32>
    %23 = tpu.matmul %17, %22, %cst_15 {dimension_numbers = #tpu.dot_dimension_numbers<[1], [0], [0], [1], [0, 0, 1, 1], [], []>} : vector<8x128xbf16>, vector<128x256xbf16>, vector<8x256xf32> -> vector<8x256xf32>
    %24 = vector.extract_strided_slice %23 {offsets = [0, 0], sizes = [8, 128], strides = [1, 1]} : vector<8x256xf32> to vector<8x128xf32>
    %25 = arith.truncf %24 : vector<8x128xf32> to vector<8x128xbf16>
    %26 = vector.extract_strided_slice %23 {offsets = [0, 128], sizes = [8, 128], strides = [1, 1]} : vector<8x256xf32> to vector<8x128xf32>
    %27 = arith.truncf %26 : vector<8x128xf32> to vector<8x128xbf16>
    %28 = tpu.iota {dimensions = array<i32: 0>} : vector<8x8xi32>
    %c8_i32 = arith.constant 8 : i32
    %29 = arith.muli %arg1, %c8_i32 : i32
    %30 = vector.broadcast %29 : i32 to vector<8x8xi32>
    %31 = arith.addi %28, %30 : vector<8x8xi32>
    %32 = tpu.iota {dimensions = array<i32: 1>} : vector<8x8xi32>
    %33 = arith.cmpi sgt, %32, %31 : vector<8x8xi32>
    %cst_16 = arith.constant -1.000000e+30 : f32
    %cst_17 = arith.constant 0.000000e+00 : f32
    %34 = vector.broadcast %cst_16 : f32 to vector<8x8xf32>
    %35 = vector.broadcast %cst_17 : f32 to vector<8x8xf32>
    %36 = arith.select %33, %34, %35 : vector<8x8xi1>, vector<8x8xf32>
    %cst_18 = arith.constant 0.000000e+00 : f32
    %37 = vector.broadcast %cst_18 : f32 to vector<8x128xf32>
    %cst_19 = arith.constant 0.000000e+00 : f32
    %38 = vector.broadcast %cst_19 : f32 to vector<8x8xf32>
    %39 = vector.extract_strided_slice %21 {offsets = [0, 0], sizes = [8, 32], strides = [1, 1]} : vector<8x128xbf16> to vector<8x32xbf16>
    %40 = vector.extract_strided_slice %25 {offsets = [0, 0], sizes = [8, 32], strides = [1, 1]} : vector<8x128xbf16> to vector<8x32xbf16>
    %41 = vector.extract_strided_slice %27 {offsets = [0, 0], sizes = [8, 32], strides = [1, 1]} : vector<8x128xbf16> to vector<8x32xbf16>
    %cst_20 = arith.constant dense<0.000000e+00> : vector<8x8xf32>
    %42 = tpu.matmul %39, %40, %cst_20 {dimension_numbers = #tpu.dot_dimension_numbers<[1], [1], [0], [0], [0, 0, 1, 0], [], []>} : vector<8x32xbf16>, vector<8x32xbf16>, vector<8x8xf32> -> vector<8x8xf32>
    %43 = arith.addf %42, %36 : vector<8x8xf32>
    %cst_21 = arith.constant dense<0xFF800000> : vector<8xf32>
    %44 = vector.multi_reduction <maximumf>, %43, %cst_21 [1] : vector<8x8xf32> to vector<8xf32>
    %45 = vector.shape_cast %44 : vector<8xf32> to vector<8x1xf32>
    %46 = vector.broadcast %45 : vector<8x1xf32> to vector<8x8xf32>
    %47 = arith.subf %43, %46 : vector<8x8xf32>
    %48 = math.exp %47 : vector<8x8xf32>
    %cst_22 = arith.constant dense<0.000000e+00> : vector<8xf32>
    %49 = vector.multi_reduction <add>, %48, %cst_22 [1] : vector<8x8xf32> to vector<8xf32>
    %50 = vector.shape_cast %49 : vector<8xf32> to vector<8x1xf32>
    %cst_23 = arith.constant 1.000000e+00 : f32
    %51 = vector.broadcast %cst_23 : f32 to vector<8x1xf32>
    %52 = arith.divf %51, %50 : vector<8x1xf32>
    %53 = vector.broadcast %52 : vector<8x1xf32> to vector<8x8xf32>
    %54 = arith.mulf %48, %53 : vector<8x8xf32>
    %55 = arith.truncf %54 : vector<8x8xf32> to vector<8x8xbf16>
    %cst_24 = arith.constant dense<0.000000e+00> : vector<8x32xf32>
    %56 = tpu.matmul %55, %41, %cst_24 {dimension_numbers = #tpu.dot_dimension_numbers<[1], [0], [0], [1], [0, 0, 1, 1], [], []>} : vector<8x8xbf16>, vector<8x32xbf16>, vector<8x32xf32> -> vector<8x32xf32>
    %57 = arith.truncf %56 : vector<8x32xf32> to vector<8x32xbf16>
    %c0_25 = arith.constant 0 : index
    %c0_26 = arith.constant 0 : index
    %c0_27 = arith.constant 0 : index
    %58 = vector.load %arg8[%c0_25, %c0_26, %c0_27] : memref<4x32x128xbf16, #tpu.memory_space<vmem>>, vector<1x32x128xbf16>
    %59 = vector.shape_cast %58 : vector<1x32x128xbf16> to vector<32x128xbf16>
    %cst_28 = arith.constant dense<0.000000e+00> : vector<8x128xf32>
    %60 = tpu.matmul %57, %59, %cst_28 {dimension_numbers = #tpu.dot_dimension_numbers<[1], [0], [0], [1], [0, 0, 1, 1], [], []>} : vector<8x32xbf16>, vector<32x128xbf16>, vector<8x128xf32> -> vector<8x128xf32>
    %61 = arith.addf %37, %60 : vector<8x128xf32>
    %62 = arith.addf %38, %54 : vector<8x8xf32>
    %63 = vector.extract_strided_slice %21 {offsets = [0, 32], sizes = [8, 32], strides = [1, 1]} : vector<8x128xbf16> to vector<8x32xbf16>
    %64 = vector.extract_strided_slice %25 {offsets = [0, 32], sizes = [8, 32], strides = [1, 1]} : vector<8x128xbf16> to vector<8x32xbf16>
    %65 = vector.extract_strided_slice %27 {offsets = [0, 32], sizes = [8, 32], strides = [1, 1]} : vector<8x128xbf16> to vector<8x32xbf16>
    %cst_29 = arith.constant dense<0.000000e+00> : vector<8x8xf32>
    %66 = tpu.matmul %63, %64, %cst_29 {dimension_numbers = #tpu.dot_dimension_numbers<[1], [1], [0], [0], [0, 0, 1, 0], [], []>} : vector<8x32xbf16>, vector<8x32xbf16>, vector<8x8xf32> -> vector<8x8xf32>
    %67 = arith.addf %66, %36 : vector<8x8xf32>
    %cst_30 = arith.constant dense<0xFF800000> : vector<8xf32>
    %68 = vector.multi_reduction <maximumf>, %67, %cst_30 [1] : vector<8x8xf32> to vector<8xf32>
    %69 = vector.shape_cast %68 : vector<8xf32> to vector<8x1xf32>
    %70 = vector.broadcast %69 : vector<8x1xf32> to vector<8x8xf32>
    %71 = arith.subf %67, %70 : vector<8x8xf32>
    %72 = math.exp %71 : vector<8x8xf32>
    %cst_31 = arith.constant dense<0.000000e+00> : vector<8xf32>
    %73 = vector.multi_reduction <add>, %72, %cst_31 [1] : vector<8x8xf32> to vector<8xf32>
    %74 = vector.shape_cast %73 : vector<8xf32> to vector<8x1xf32>
    %cst_32 = arith.constant 1.000000e+00 : f32
    %75 = vector.broadcast %cst_32 : f32 to vector<8x1xf32>
    %76 = arith.divf %75, %74 : vector<8x1xf32>
    %77 = vector.broadcast %76 : vector<8x1xf32> to vector<8x8xf32>
    %78 = arith.mulf %72, %77 : vector<8x8xf32>
    %79 = arith.truncf %78 : vector<8x8xf32> to vector<8x8xbf16>
    %cst_33 = arith.constant dense<0.000000e+00> : vector<8x32xf32>
    %80 = tpu.matmul %79, %65, %cst_33 {dimension_numbers = #tpu.dot_dimension_numbers<[1], [0], [0], [1], [0, 0, 1, 1], [], []>} : vector<8x8xbf16>, vector<8x32xbf16>, vector<8x32xf32> -> vector<8x32xf32>
    %81 = arith.truncf %80 : vector<8x32xf32> to vector<8x32xbf16>
    %c1 = arith.constant 1 : index
    %c0_34 = arith.constant 0 : index
    %c0_35 = arith.constant 0 : index
    %82 = vector.load %arg8[%c1, %c0_34, %c0_35] : memref<4x32x128xbf16, #tpu.memory_space<vmem>>, vector<1x32x128xbf16>
    %83 = vector.shape_cast %82 : vector<1x32x128xbf16> to vector<32x128xbf16>
    %cst_36 = arith.constant dense<0.000000e+00> : vector<8x128xf32>
    %84 = tpu.matmul %81, %83, %cst_36 {dimension_numbers = #tpu.dot_dimension_numbers<[1], [0], [0], [1], [0, 0, 1, 1], [], []>} : vector<8x32xbf16>, vector<32x128xbf16>, vector<8x128xf32> -> vector<8x128xf32>
    %85 = arith.addf %61, %84 : vector<8x128xf32>
    %86 = arith.addf %62, %78 : vector<8x8xf32>
    %87 = vector.extract_strided_slice %21 {offsets = [0, 64], sizes = [8, 32], strides = [1, 1]} : vector<8x128xbf16> to vector<8x32xbf16>
    %88 = vector.extract_strided_slice %25 {offsets = [0, 64], sizes = [8, 32], strides = [1, 1]} : vector<8x128xbf16> to vector<8x32xbf16>
    %89 = vector.extract_strided_slice %27 {offsets = [0, 64], sizes = [8, 32], strides = [1, 1]} : vector<8x128xbf16> to vector<8x32xbf16>
    %cst_37 = arith.constant dense<0.000000e+00> : vector<8x8xf32>
    %90 = tpu.matmul %87, %88, %cst_37 {dimension_numbers = #tpu.dot_dimension_numbers<[1], [1], [0], [0], [0, 0, 1, 0], [], []>} : vector<8x32xbf16>, vector<8x32xbf16>, vector<8x8xf32> -> vector<8x8xf32>
    %91 = arith.addf %90, %36 : vector<8x8xf32>
    %cst_38 = arith.constant dense<0xFF800000> : vector<8xf32>
    %92 = vector.multi_reduction <maximumf>, %91, %cst_38 [1] : vector<8x8xf32> to vector<8xf32>
    %93 = vector.shape_cast %92 : vector<8xf32> to vector<8x1xf32>
    %94 = vector.broadcast %93 : vector<8x1xf32> to vector<8x8xf32>
    %95 = arith.subf %91, %94 : vector<8x8xf32>
    %96 = math.exp %95 : vector<8x8xf32>
    %cst_39 = arith.constant dense<0.000000e+00> : vector<8xf32>
    %97 = vector.multi_reduction <add>, %96, %cst_39 [1] : vector<8x8xf32> to vector<8xf32>
    %98 = vector.shape_cast %97 : vector<8xf32> to vector<8x1xf32>
    %cst_40 = arith.constant 1.000000e+00 : f32
    %99 = vector.broadcast %cst_40 : f32 to vector<8x1xf32>
    %100 = arith.divf %99, %98 : vector<8x1xf32>
    %101 = vector.broadcast %100 : vector<8x1xf32> to vector<8x8xf32>
    %102 = arith.mulf %96, %101 : vector<8x8xf32>
    %103 = arith.truncf %102 : vector<8x8xf32> to vector<8x8xbf16>
    %cst_41 = arith.constant dense<0.000000e+00> : vector<8x32xf32>
    %104 = tpu.matmul %103, %89, %cst_41 {dimension_numbers = #tpu.dot_dimension_numbers<[1], [0], [0], [1], [0, 0, 1, 1], [], []>} : vector<8x8xbf16>, vector<8x32xbf16>, vector<8x32xf32> -> vector<8x32xf32>
    %105 = arith.truncf %104 : vector<8x32xf32> to vector<8x32xbf16>
    %c2 = arith.constant 2 : index
    %c0_42 = arith.constant 0 : index
    %c0_43 = arith.constant 0 : index
    %106 = vector.load %arg8[%c2, %c0_42, %c0_43] : memref<4x32x128xbf16, #tpu.memory_space<vmem>>, vector<1x32x128xbf16>
    %107 = vector.shape_cast %106 : vector<1x32x128xbf16> to vector<32x128xbf16>
    %cst_44 = arith.constant dense<0.000000e+00> : vector<8x128xf32>
    %108 = tpu.matmul %105, %107, %cst_44 {dimension_numbers = #tpu.dot_dimension_numbers<[1], [0], [0], [1], [0, 0, 1, 1], [], []>} : vector<8x32xbf16>, vector<32x128xbf16>, vector<8x128xf32> -> vector<8x128xf32>
    %109 = arith.addf %85, %108 : vector<8x128xf32>
    %110 = arith.addf %86, %102 : vector<8x8xf32>
    %111 = vector.extract_strided_slice %21 {offsets = [0, 96], sizes = [8, 32], strides = [1, 1]} : vector<8x128xbf16> to vector<8x32xbf16>
    %112 = vector.extract_strided_slice %25 {offsets = [0, 96], sizes = [8, 32], strides = [1, 1]} : vector<8x128xbf16> to vector<8x32xbf16>
    %113 = vector.extract_strided_slice %27 {offsets = [0, 96], sizes = [8, 32], strides = [1, 1]} : vector<8x128xbf16> to vector<8x32xbf16>
    %cst_45 = arith.constant dense<0.000000e+00> : vector<8x8xf32>
    %114 = tpu.matmul %111, %112, %cst_45 {dimension_numbers = #tpu.dot_dimension_numbers<[1], [1], [0], [0], [0, 0, 1, 0], [], []>} : vector<8x32xbf16>, vector<8x32xbf16>, vector<8x8xf32> -> vector<8x8xf32>
    %115 = arith.addf %114, %36 : vector<8x8xf32>
    %cst_46 = arith.constant dense<0xFF800000> : vector<8xf32>
    %116 = vector.multi_reduction <maximumf>, %115, %cst_46 [1] : vector<8x8xf32> to vector<8xf32>
    %117 = vector.shape_cast %116 : vector<8xf32> to vector<8x1xf32>
    %118 = vector.broadcast %117 : vector<8x1xf32> to vector<8x8xf32>
    %119 = arith.subf %115, %118 : vector<8x8xf32>
    %120 = math.exp %119 : vector<8x8xf32>
    %cst_47 = arith.constant dense<0.000000e+00> : vector<8xf32>
    %121 = vector.multi_reduction <add>, %120, %cst_47 [1] : vector<8x8xf32> to vector<8xf32>
    %122 = vector.shape_cast %121 : vector<8xf32> to vector<8x1xf32>
    %cst_48 = arith.constant 1.000000e+00 : f32
    %123 = vector.broadcast %cst_48 : f32 to vector<8x1xf32>
    %124 = arith.divf %123, %122 : vector<8x1xf32>
    %125 = vector.broadcast %124 : vector<8x1xf32> to vector<8x8xf32>
    %126 = arith.mulf %120, %125 : vector<8x8xf32>
    %127 = arith.truncf %126 : vector<8x8xf32> to vector<8x8xbf16>
    %cst_49 = arith.constant dense<0.000000e+00> : vector<8x32xf32>
    %128 = tpu.matmul %127, %113, %cst_49 {dimension_numbers = #tpu.dot_dimension_numbers<[1], [0], [0], [1], [0, 0, 1, 1], [], []>} : vector<8x8xbf16>, vector<8x32xbf16>, vector<8x32xf32> -> vector<8x32xf32>
    %129 = arith.truncf %128 : vector<8x32xf32> to vector<8x32xbf16>
    %c3 = arith.constant 3 : index
    %c0_50 = arith.constant 0 : index
    %c0_51 = arith.constant 0 : index
    %130 = vector.load %arg8[%c3, %c0_50, %c0_51] : memref<4x32x128xbf16, #tpu.memory_space<vmem>>, vector<1x32x128xbf16>
    %131 = vector.shape_cast %130 : vector<1x32x128xbf16> to vector<32x128xbf16>
    %cst_52 = arith.constant dense<0.000000e+00> : vector<8x128xf32>
    %132 = tpu.matmul %129, %131, %cst_52 {dimension_numbers = #tpu.dot_dimension_numbers<[1], [0], [0], [1], [0, 0, 1, 1], [], []>} : vector<8x32xbf16>, vector<32x128xbf16>, vector<8x128xf32> -> vector<8x128xf32>
    %133 = arith.addf %109, %132 : vector<8x128xf32>
    %134 = arith.addf %110, %126 : vector<8x8xf32>
    %c0_53 = arith.constant 0 : index
    %c0_54 = arith.constant 0 : index
    %135 = vector.load %arg9[%c0_53, %c0_54] : memref<1x128xf32, #tpu.memory_space<vmem>>, vector<1x128xf32>
    %136 = vector.shape_cast %135 : vector<1x128xf32> to vector<128xf32>
    %137 = vector.shape_cast %136 : vector<128xf32> to vector<1x128xf32>
    %138 = vector.broadcast %137 : vector<1x128xf32> to vector<8x128xf32>
    %139 = arith.addf %133, %138 : vector<8x128xf32>
    %140 = arith.addf %139, %16 : vector<8x128xf32>
    %cst_55 = arith.constant dense<0.000000e+00> : vector<8xf32>
    %141 = vector.multi_reduction <add>, %140, %cst_55 [1] : vector<8x128xf32> to vector<8xf32>
    %142 = vector.shape_cast %141 : vector<8xf32> to vector<8x1xf32>
    %cst_56 = arith.constant 1.280000e+02 : f32
    %143 = vector.broadcast %cst_56 : f32 to vector<8x1xf32>
    %144 = arith.divf %142, %143 : vector<8x1xf32>
    %145 = vector.broadcast %144 : vector<8x1xf32> to vector<8x128xf32>
    %146 = arith.subf %140, %145 : vector<8x128xf32>
    %147 = arith.mulf %146, %146 : vector<8x128xf32>
    %cst_57 = arith.constant dense<0.000000e+00> : vector<8xf32>
    %148 = vector.multi_reduction <add>, %147, %cst_57 [1] : vector<8x128xf32> to vector<8xf32>
    %149 = vector.shape_cast %148 : vector<8xf32> to vector<8x1xf32>
    %cst_58 = arith.constant 1.280000e+02 : f32
    %150 = vector.broadcast %cst_58 : f32 to vector<8x1xf32>
    %151 = arith.divf %149, %150 : vector<8x1xf32>
    %cst_59 = arith.constant 9.99999974E-6 : f32
    %152 = vector.broadcast %cst_59 : f32 to vector<8x1xf32>
    %153 = arith.addf %151, %152 : vector<8x1xf32>
    %154 = math.rsqrt %153 : vector<8x1xf32>
    %155 = vector.broadcast %154 : vector<8x1xf32> to vector<8x128xf32>
    %156 = arith.mulf %146, %155 : vector<8x128xf32>
    %c0_60 = arith.constant 0 : index
    %c0_61 = arith.constant 0 : index
    %157 = vector.load %arg10[%c0_60, %c0_61] : memref<1x128xf32, #tpu.memory_space<vmem>>, vector<1x128xf32>
    %158 = vector.shape_cast %157 : vector<1x128xf32> to vector<128xf32>
    %159 = vector.shape_cast %158 : vector<128xf32> to vector<1x128xf32>
    %160 = vector.broadcast %159 : vector<1x128xf32> to vector<8x128xf32>
    %161 = arith.mulf %156, %160 : vector<8x128xf32>
    %c0_62 = arith.constant 0 : index
    %c0_63 = arith.constant 0 : index
    %162 = vector.load %arg11[%c0_62, %c0_63] : memref<1x128xf32, #tpu.memory_space<vmem>>, vector<1x128xf32>
    %163 = vector.shape_cast %162 : vector<1x128xf32> to vector<128xf32>
    %164 = vector.shape_cast %163 : vector<128xf32> to vector<1x128xf32>
    %165 = vector.broadcast %164 : vector<1x128xf32> to vector<8x128xf32>
    %166 = arith.addf %161, %165 : vector<8x128xf32>
    %c0_64 = arith.constant 0 : index
    %c0_65 = arith.constant 0 : index
    %c0_66 = arith.constant 0 : index
    %167 = vector.load %arg12[%c0_64, %c0_65, %c0_66] : memref<1x8x128xf32, #tpu.memory_space<vmem>>, vector<1x8x128xf32>
    %168 = vector.shape_cast %167 : vector<1x8x128xf32> to vector<8x128xf32>
    %169 = vector.shape_cast %166 : vector<8x128xf32> to vector<1x8x128xf32>
    tpu.vector_store %arg12[%c0_64, %c0_65, %c0_66], %169 {strides = array<i32>} : memref<1x8x128xf32, #tpu.memory_space<vmem>>, vector<1x8x128xf32>,
    %cst_67 = arith.constant 2.500000e-01 : f32
    %170 = vector.broadcast %cst_67 : f32 to vector<8x8xf32>
    %171 = arith.mulf %134, %170 : vector<8x8xf32>
    %c0_68 = arith.constant 0 : index
    %c0_69 = arith.constant 0 : index
    %c0_70 = arith.constant 0 : index
    %172 = vector.load %arg13[%c0_68, %c0_69, %c0_70] : memref<1x8x8xf32, #tpu.memory_space<vmem>>, vector<1x8x8xf32>
    %173 = vector.shape_cast %172 : vector<1x8x8xf32> to vector<8x8xf32>
    %174 = vector.shape_cast %171 : vector<8x8xf32> to vector<1x8x8xf32>
    tpu.vector_store %arg13[%c0_68, %c0_69, %c0_70], %174 {strides = array<i32>} : memref<1x8x8xf32, #tpu.memory_space<vmem>>, vector<1x8x8xf32>,
    return
  }
  func.func @transform_0(%arg0: i32, %arg1: i32) -> (i32, i32, i32) {
    %c0_i32 = arith.constant 0 : i32
    %c0_i32_0 = arith.constant 0 : i32
    %c0_i32_1 = arith.constant 0 : i32
    return %arg0, %c0_i32, %c0_i32_0 : i32, i32, i32
  }
  func.func @transform_1(%arg0: i32, %arg1: i32) -> (i32, i32, i32) {
    %c0_i32 = arith.constant 0 : i32
    %c0_i32_0 = arith.constant 0 : i32
    return %arg0, %arg1, %c0_i32 : i32, i32, i32
  }
  func.func @transform_2(%arg0: i32, %arg1: i32) -> (i32, i32) {
    %c0_i32 = arith.constant 0 : i32
    %c0_i32_0 = arith.constant 0 : i32
    %c0_i32_1 = arith.constant 0 : i32
    return %c0_i32, %c0_i32_0 : i32, i32
  }
  func.func @transform_3(%arg0: i32, %arg1: i32) -> (i32, i32) {
    %c0_i32 = arith.constant 0 : i32
    %c0_i32_0 = arith.constant 0 : i32
    %c0_i32_1 = arith.constant 0 : i32
    return %c0_i32, %c0_i32_0 : i32, i32
  }
  func.func @transform_4(%arg0: i32, %arg1: i32) -> (i32, i32) {
    %c0_i32 = arith.constant 0 : i32
    %c0_i32_0 = arith.constant 0 : i32
    %c0_i32_1 = arith.constant 0 : i32
    return %c0_i32, %c0_i32_0 : i32, i32
  }
  func.func @transform_5(%arg0: i32, %arg1: i32) -> (i32, i32) {
    %c0_i32 = arith.constant 0 : i32
    %c0_i32_0 = arith.constant 0 : i32
    %c0_i32_1 = arith.constant 0 : i32
    return %c0_i32, %c0_i32_0 : i32, i32
  }
  func.func @transform_6(%arg0: i32, %arg1: i32) -> (i32, i32, i32) {
    %c0_i32 = arith.constant 0 : i32
    %c0_i32_0 = arith.constant 0 : i32
    %c0_i32_1 = arith.constant 0 : i32
    %c0_i32_2 = arith.constant 0 : i32
    return %c0_i32, %c0_i32_0, %c0_i32_1 : i32, i32, i32
  }
  func.func @transform_7(%arg0: i32, %arg1: i32) -> (i32, i32) {
    %c0_i32 = arith.constant 0 : i32
    %c0_i32_0 = arith.constant 0 : i32
    %c0_i32_1 = arith.constant 0 : i32
    return %c0_i32, %c0_i32_0 : i32, i32
  }
  func.func @transform_8(%arg0: i32, %arg1: i32) -> (i32, i32) {
    %c0_i32 = arith.constant 0 : i32
    %c0_i32_0 = arith.constant 0 : i32
    %c0_i32_1 = arith.constant 0 : i32
    return %c0_i32, %c0_i32_0 : i32, i32
  }
  func.func @transform_9(%arg0: i32, %arg1: i32) -> (i32, i32) {
    %c0_i32 = arith.constant 0 : i32
    %c0_i32_0 = arith.constant 0 : i32
    %c0_i32_1 = arith.constant 0 : i32
    return %c0_i32, %c0_i32_0 : i32, i32
  }
  func.func @transform_10(%arg0: i32, %arg1: i32) -> (i32, i32, i32) {
    %c0_i32 = arith.constant 0 : i32
    %c0_i32_0 = arith.constant 0 : i32
    return %arg0, %arg1, %c0_i32 : i32, i32, i32
  }
  func.func @transform_11(%arg0: i32, %arg1: i32) -> (i32, i32, i32) {
    %c0_i32 = arith.constant 0 : i32
    %c0_i32_0 = arith.constant 0 : i32
    return %arg0, %arg1, %c0_i32 : i32, i32, i32
  }
}

</mosaic_0001>

<bundles_post_ra>
// kernel: tpu_custom_call.1
= control target key start
LH: loop header
LB: loop body
LE: loop exit
PB: predicated region body
PF: predicated region fallthrough
CT: control target
= control target key end

     0   :  { %s2561_s0 = inlined_call_operand.hbm [shape: f32[2,8,64], index: 0, kind: input, shape index: {}]   ;;  %s2562_s1 = inlined_call_operand.hbm [shape: f32[2,8,64], index: 1, kind: input, shape index: {}]   ;;  %s2563_s2 = inlined_call_operand.hbm [shape: bf16[64,128], index: 2, kind: input, shape index: {}]   ;;  %s2564_s3 = inlined_call_operand.vmem [shape: f32[1,128], index: 3, kind: input, shape index: {}]   ;;  %s2565_s4 = inlined_call_operand.hbm [shape: bf16[128,128], index: 4, kind: input, shape index: {}]   ;;  %s2566_s5 = inlined_call_operand.hbm [shape: bf16[128,256], index: 5, kind: input, shape index: {}]   ;;  %s2567_s6 = inlined_call_operand.hbm [shape: bf16[4,32,128], index: 6, kind: input, shape index: {}]   ;;  %s2568_s7 = inlined_call_operand.vmem [shape: f32[1,128], index: 7, kind: input, shape index: {}]   ;;  %s2569_s8 = inlined_call_operand.vmem [shape: f32[1,128], index: 8, kind: input, shape index: {}]   ;;  %s2570_s9 = inlined_call_operand.vmem [shape: f32[1,128], index: 9, kind: input, shape index: {}]   ;;  %s2571_s10 = inlined_call_operand.hbm [shape: f32[2,8,128], index: 10, kind: output, shape index: {0}]   ;;  %s2572_s11 = inlined_call_operand.hbm [shape: f32[2,8,8], index: 11, kind: output, shape index: {1}]  }
   0x1   :  { %2579 = sst [smem:[#allocation29_spill]] %s2563_s2 }
   0x2   :  { %2580 = sst [smem:[#allocation30_spill]] %s2565_s4 }
   0x3   :  { %2581 = sst [smem:[#allocation31_spill]] %s2566_s5 }
   0x4   :  { %2582 = sst [smem:[#allocation32_spill]] %s2567_s6 }
   0x5   :  { %2583 = sst [smem:[#allocation33_spill]] %s2570_s9 }
   0x6   :  { %2584 = sst [smem:[#allocation34_spill]] %s2571_s10 }
   0x7   :  { %17 = vsyncpa [#allocation3], 0 }
   0x8   :  { %19 = vsyncpa [#allocation3 + $0x1], 0 }
   0x9   :  { %20 = vsyncpa [#allocation6], 0 }
   0xa   :  { %22 = vsyncpa [#allocation6 + $0x1], 0 }
   0xb   :  { %23 = vsyncpa [#allocation9], 0 }
   0xc   :  { %24 = vsyncpa [#allocation12], 0 }
   0xd   :  { %25 = vsyncpa [#allocation4], 0 }
   0xe   :  { %27 = vsyncpa [#allocation4 + $0x1], 0 }
   0xf   :  { %28 = vsyncpa [#allocation15], 0 }
  0x10   :  { %30 = vsyncpa [#allocation15 + $0x1], 0  ;;  %s2263_s17 = smov 0   ;;  %s2265_s18 = smov 0  }
  0x11   :  { %s2267_s19 = smov 0   ;;  %s2269_s20 = smov 0  }
  0x12   :  { %s2271_s21 = smov 0   ;;  %s2273_s22 = smov 0  }
  0x13 LB: > { %2585 = sst [smem:[#allocation23_spill]] %s2168_s17  ;;  %s2294_s23 = sadd.s32 4294967295, %s2188_s22   ;;  %s2188_s22 = sphi %s2273_s22, %s36_s22   ;;  %s2184_s21 = sphi %s2271_s21, %s2608_s21   ;;  %s2180_s20 = sphi %s2269_s20, %s2607_s20   ;;  %s2176_s19 = sphi %s2267_s19, %s2606_s19   ;;  %s2172_s18 = sphi %s2265_s18, %s2610_s18   ;;  %s2168_s17 = sphi %s2263_s17, %s2609_s17  }
  0x14   : > { %2586 = sst [smem:[#allocation24_spill]] %s2176_s19  ;;  %p1513_p0 = scmp.ge.s32.totalorder %s2188_s22, 1 }
  0x15   : > { %2587 = sst [smem:[#allocation25_spill]] %s2184_s21  ;;  %p69_p1 = scmp.eq.s32.totalorder %s2294_s23, 0 }
  0x16   : > { %p331_p2 = scmp.lt.s32.totalorder %s2188_s22, 3  ;;  %s2588_s2 = sld [smem:[#allocation29_spill]] }
  0x17   : > { %s2190_s28 = smov [#allocation7]   ;;  %p1518_p6 = scmp.ge.s32.totalorder %s2188_s22, 2 }
  0x18   : > { %p2302_p3 = pnand %p1513_p0, %p331_p2  ;;  %s344_s29 = sshll.u32 %s2190_s28, 4  ;;  %s345_s29 = int_to_ptr.vmem [resolvable:$true] %s344_s29 }
  0x19   : > { %s2591_s4 = sld [smem:[#allocation30_spill]]  ;;  %s2191_s15 = smov 64  }
  0x1a   : > { %p1756_p4 = pneg %p2302_p3  ;;  %s2192_s16 = smov 4  }
  0x1b   : > { %s2193_s24 = smov [#allocation8]   ;;  %s2592_s5 = sld [smem:[#allocation31_spill]] }
  0x1c   : > { %s342_s26 = sshll.u32 %s2588_s2, 4  ;;  %p2310_p5 = pnand %p1756_p4, %p69_p1  ;;  %s343_s26 = int_to_ptr.hbm [resolvable:$true] %s342_s26 }
  0x1d   : > { %s361_s25 = sshll.u32 %s2193_s24, 4  ;;  %s2194_s12 = smov [#allocation10]   ;;  %s362_s25 = int_to_ptr.vmem [resolvable:$true] %s361_s25 }
  0x1e   : > { %1759 = dma.hbm_to_vmem [thread:$0]  (!%p2310_p5), %s343_s26, 512, %s345_s29, [#allocation6], %s2191_s15, %s2191_s15, %s2192_s16  }
  0x1f   : > { %s359_s14 = sshll.u32 %s2591_s4, 4  ;;  %s375_s13 = sshll.u32 %s2194_s12, 4  ;;  %s360_s14 = int_to_ptr.hbm [resolvable:$true] %s359_s14  ;;  %s376_s13 = int_to_ptr.vmem [resolvable:$true] %s375_s13 }
  0x20   : > { %1762 = dma.hbm_to_vmem [thread:$0]  (!%p2310_p5), %s360_s14, 1024, %s362_s25, [#allocation9], %s2191_s15, %s2191_s15, %s2192_s16  }
  0x21   : > { %s373_s9 = sshll.u32 %s2592_s5, 4  ;;  %s2593_s6 = sld [smem:[#allocation32_spill]]  ;;  %s374_s9 = int_to_ptr.hbm [resolvable:$true] %s373_s9 }
  0x22   : > { %s2195_s2 = smov 128   ;;  %s2196_s28 = smov 8  }
  0x23   : > { %1765 = dma.hbm_to_vmem [thread:$0]  (!%p2310_p5), %s374_s9, 2048, %s376_s13, [#allocation9], %s2195_s2, %s2195_s2, %s2196_s28  }
  0x24   : > { %s2197_s14 = smov [#allocation11]   ;;  %s1512_s12 = sadd.s32 4294967294, %s2188_s22  }
  0x25   : > { %s389_s25 = sshll.u32 %s2197_s14, 4  ;;  %s48_s4 = sadd.s32 1, %s2184_s21  ;;  %s390_s25 = int_to_ptr.vmem [resolvable:$true] %s389_s25 }
  0x26   : > { %p50_p7 = scmp.ge.s32.totalorder %s48_s4, 2  ;;  %s55_s26 = sadd.s32 1, %s2176_s19 }
  0x27   : > { %s387_s24 = sshll.u32 %s2593_s6, 4  ;;  %p62_p8 = scmp.ne.s32.totalorder %s2176_s19, %s2172_s18  ;;  %s388_s24 = int_to_ptr.hbm [resolvable:$true] %s387_s24 }
  0x28   : > { %1768 = dma.hbm_to_vmem [thread:$0]  (!%p2310_p5), %s388_s24, 1024, %s390_s25, [#allocation12], %s2191_s15, %s2191_s15, %s2192_s16  }
  0x29   : > { %p63_p9 = scmp.eq.s32.totalorder %s2188_s22, 0  ;;  %s2612_s4 = smov (%p50_p7, %s48_s4), 0 }
  0x2a   : > { %2594 = sst [smem:[#allocation26_spill]] %s2612_s4  ;;  %p68_p11 = scmp.ne.s32.totalorder %s2172_s18, %s2168_s17 }
  0x2b   : > { %p2340_p10 = por %p63_p9, %p62_p8  ;;  %s52_s30 = ssub.s32 %s2184_s21, %s2612_s4 }
  0x2c   : > { %p290_p12 = scmp.eq.s32.totalorder %s2294_s23, 1  ;;  %p53_p13 = scmp.eq.s32.totalorder %s52_s30, 0 }
  0x2d   : > { %p2351_p0 = por %p69_p1, %p68_p11  ;;  %p296_p4 = scmp.eq.s32.totalorder %s1512_s12, 1 }
  0x2e   : > { %p2355_p2 = por %p290_p12, %p62_p8  ;;  %p1787_p7 = scmp.lt.s32.totalorder %s2188_s22, 2 }
  0x2f   : > { %s2360_s13 = scalar_select %p53_p13, %s2176_s19, %s55_s26  }
  0x30   : > { %p2362_p5 = por %p296_p4, %p68_p11  ;;  %s412_s24 = sand.u32 1, %s2176_s19  }
  0x31   : > { %2598 = sst [smem:[#allocation27_spill]] %s2360_s13  ;;  %s1520_s2 = sshll.u32 %s2184_s21, 3 }
  0x32   : > { %s2599_s29 = scalar_select %p2362_p5, 1, 0 }
  0x33   : > { %s1519_s28 = sshll.u32 %s412_s24, 3  ;;  %s420_s30 = scalar_lea.hbm %s2561_s0, %s1520_s2 }
  0x34   : > { %2600 = sst [smem:[#allocation28_spill]] %s2599_s29  ;;  %s422_s5 = sshll.u32 %s420_s30, 4  ;;  %s423_s5 = int_to_ptr.hbm [resolvable:$true] %s422_s5 }
  0x35   : > { %s416_s6 = scalar_lea.vmem [#allocation2], %s1519_s28  ;;  %p1770_p8 = pnand %p1787_p7, %p2340_p10 }
  0x36   : > { %s424_s4 = sshll.u32 %s416_s6, 4  ;;  %s440_s13 = scalar_lea.hbm %s2562_s1, %s1520_s2  ;;  %s425_s4 = int_to_ptr.vmem [resolvable:$true] %s424_s4 }
  0x37   : > { %s431_s29 = sand.u32 1, %s2188_s22   ;;  %s413_s17 = scalar_lea.sflag [#allocation3], %s412_s24 }
  0x38   : > { %1772 = dma.hbm_to_vmem [thread:$0]  (!%p1770_p8), %s423_s5, 128, %s425_s4, %s413_s17  }
  0x39   : > { %s442_s21 = sshll.u32 %s440_s13, 4  ;;  %s435_s19 = scalar_lea.vmem [#allocation5], %s1519_s28  ;;  %s443_s21 = int_to_ptr.hbm [resolvable:$true] %s442_s21 }
  0x3a   : > { %s444_s10 = sshll.u32 %s435_s19, 4  ;;  %s432_s14 = scalar_lea.sflag [#allocation6], %s431_s29  ;;  %s445_s10 = int_to_ptr.vmem [resolvable:$true] %s444_s10 }
  0x3b   : > { %1775 = dma.hbm_to_vmem [thread:$0]  (!%p1770_p8), %s443_s21, 128, %s445_s10, %s432_s14  }
  0x3c   : > { %453 = sbr.rel (%p2302_p3) target bundleno = 1839 (0x72f), region = 60  ;;  %s2381_s6 = sand.u32 (!%p2302_p3), 1, %s2172_s18  }
  0x3d   : > { %s2384_s9 = sshll.u32 (!%p2302_p3), %s2381_s6, 3  ;;  %s456_s4 = scalar_lea.sflag (!%p2302_p3), [#allocation3], %s2381_s6 }
  0x3e   : > { %s459_s5 = scalar_lea.vmem (!%p2302_p3), [#allocation2], %s2384_s9 }
  0x41   : > { %2139 = dma.done.wait (%p2351_p0), %s456_s4, 128  }
  0x42   : > { %2141 = vsyncadd (%p2351_p0), %s456_s4, 4294967168  ;;  %s465_s10 = sand.u32 1, %s2294_s23   ;;  %s469_s19 = scalar_lea.vmem [#allocation5], %s2384_s9 }
  0x43   : > { %s466_s17 = scalar_lea.sflag [#allocation6], %s465_s10 }
  0x44   : > { %2143 = dma.done.wait (%p2351_p0), %s466_s17, 128  }
  0x45   : > { %2145 = vsyncadd (%p2351_p0), %s466_s17, 4294967168 }
  0x46   : > { %2147 = dma.done.wait (%p69_p1), [#allocation6], 512  }
  0x47   : > { %2149 = vsyncadd (%p69_p1), [#allocation6], 4294966784 }
  0x48   : > { %2151 = dma.done.wait (%p69_p1), [#allocation9], 3072  }
  0x49   : > { %2153 = vsyncadd (%p69_p1), [#allocation9], 4294964224 }
  0x4a   : > { %2155 = dma.done.wait (%p69_p1), [#allocation12], 1024  }
  0x4b   : > { %2157 = vsyncadd (%p69_p1), [#allocation12], 4294966272  ;;  %v1699_v0 = vld [vmem:[#allocation7 + $0x18] sm:$0xff]  ;;  %v1698_v1 = vld [vmem:[#allocation7 + $0x10] sm:$0xff]  ;;  %vm578_vm0 = vcmask 523264   ;;  %vm826_vm1 = vcmask 261120  }
  0x4c   : > { %586 = vmatpush.bf16.msra.mxu0 %v1699_v0  ;;  %604 = vmatpush.bf16.msra.mxu1 %v1699_v0  ;;  %v1707_v2 = vld [vmem:[#allocation8 + $0x38] sm:$0xff]  ;;  %v1640_v3 = vld [vmem:[#allocation10 + $0x70] sm:$0xf]  ;;  %v1632_v7 = vld [vmem:[#allocation10 + $0x60] sm:$0xf]  ;;  %vm876_vm2 = vcmask 1043456  }
  0x4d   : > { %v1723_v4 = vld [vmem:[#allocation10 + $0x74] sm:$0xf0]  ;;  %679 = vmatpush.bf16.msra.mxu2 %v1707_v2  ;;  %v1706_v6 = vld [vmem:[#allocation8 + $0x30] sm:$0xff]  ;;  %v1721_v8 = vld [vmem:[#allocation10 + $0x64] sm:$0xf0]  ;;  %s2198_s27 = smov 64  }
  0x4e   : > { %v1641_v5 = vor.u32 %v1723_v4, %v1640_v3  ;;  %v1633_v9 = vor.u32 %v1721_v8, %v1632_v7  ;;  %v1697_v10 = vld [vmem:[#allocation7 + $0x8] sm:$0xff]  ;;  %v1624_v11 = vld [vmem:[#allocation10 + $0x50] sm:$0xf]  ;;  %v1719_v12 = vld [vmem:[#allocation10 + $0x54] sm:$0xf0]  ;;  %s2199_s15 = smov 96  }
  0x4f   : > { %v1722_v13 = vld [vmem:[#allocation10 + $0x74] sm:$0xf]  ;;  %v1642_v14 = vld [vmem:[#allocation10 + $0x78] sm:$0xf0]  ;;  %v1705_v15 = vld [vmem:[#allocation8 + $0x28] sm:$0xff]  ;;  %v1625_v16 = vor.u32 %v1719_v12, %v1624_v11  ;;  %s2200_s13 = smov 32  }
  0x50   : > { %789 = vmatpush.bf16.msra.mxu3 %v1641_v5  ;;  %587 = vmatpush.bf16.msra.mxu0 %v1698_v1  ;;  %v1696_v17 = vld [vmem:[#allocation7] sm:$0xff]  ;;  %v595_v19 = vld [vmem:[%s469_s19] sm:$0xff]  ;;  %v1645_v20 = vor.u32 %v1722_v13, %v1642_v14  ;;  %v1717_v22 = vld [vmem:[#allocation10 + $0x44] sm:$0xf0]  ;;  %vm846_vm4 = vcmask 64512   ;;  %s538_s29 = scalar_lea.vmem [#allocation14], %s2384_s9 }
  0x51   : > { %605 = vmatpush.bf16.msra.mxu1 %v1698_v1  ;;  %680 = vmatpush.bf16.msra.mxu2 %v1706_v6  ;;  %v549_v18 = vld [vmem:[%s459_s5] sm:$0xff]  ;;  %v596_v27 = vpack.c.bf16 %v595_v19, %v595_v19  ;;  %v1608_v30 = vld [vmem:[#allocation10 + $0x30] sm:$0xf]  ;;  %v1715_v31 = vld [vmem:[#allocation10 + $0x34] sm:$0xf0]  ;;  %s1692_s28 = sshll.u32 %s2180_s20, 3 }
  0x52   : > { %v1616_v21 = vld [vmem:[#allocation10 + $0x40] sm:$0xf]  ;;  %v1720_v23 = vld [vmem:[#allocation10 + $0x64] sm:$0xf]  ;;  %v1634_v24 = vld [vmem:[#allocation10 + $0x68] sm:$0xf0]  ;;  %v550_v26 = vpack.c.bf16 %v549_v18, %v549_v18  ;;  %v1609_v35 = vor.u32 %v1715_v31, %v1608_v30  ;;  %s1331_s12 = scalar_lea.hbm %s2572_s11, %s1692_s28 }
  0x53   : > { %v1704_v25 = vld [vmem:[#allocation8 + $0x20] sm:$0xff]  ;;  %v1617_v28 = vor.u32 %v1717_v22, %v1616_v21  ;;  %v1637_v29 = vor.u32 %v1720_v23, %v1634_v24  ;;  %v1718_v32 = vld [vmem:[#allocation10 + $0x54] sm:$0xf]  ;;  %v1626_v33 = vld [vmem:[#allocation10 + $0x58] sm:$0xf0]  ;;  %s1333_s26 = sshll.u32 %s538_s29, 4  ;;  %s1334_s26 = int_to_ptr.vmem [resolvable:$true] %s1333_s26 }
  0x54   : > { %790 = vmatpush.bf16.msra.mxu3 %v1633_v9  ;;  %588 = vmatpush.bf16.msra.mxu0 %v1697_v10  ;;  %v1703_v34 = vld [vmem:[#allocation8 + $0x18] sm:$0xff]  ;;  %v1629_v36 = vor.u32 %v1718_v32, %v1626_v33  ;;  %v1600_v37 = vld [vmem:[#allocation10 + $0x20] sm:$0xf]  ;;  %v1713_v38 = vld [vmem:[#allocation10 + $0x24] sm:$0xf0]  ;;  %v2201_v32 = vmov 0.0  }
  0x55   : > { %606 = vmatpush.bf16.msra.mxu1 %v1697_v10  ;;  %681 = vmatpush.bf16.msra.mxu2 %v1705_v15  ;;  %v1716_v39 = vld [vmem:[#allocation10 + $0x44] sm:$0xf]  ;;  %v1618_v40 = vld [vmem:[#allocation10 + $0x48] sm:$0xf0]  ;;  %v1702_v41 = vld [vmem:[#allocation8 + $0x10] sm:$0xff]  ;;  %v1601_v42 = vor.u32 %v1713_v38, %v1600_v37  ;;  %s1335_s14 = sshll.u32 %s1331_s12, 4  ;;  %s1336_s14 = int_to_ptr.hbm [resolvable:$true] %s1335_s14 }
  0x56   : > { %v1621_v43 = vor.u32 %v1716_v39, %v1618_v40  ;;  %v1592_v44 = vld [vmem:[#allocation10 + $0x10] sm:$0xf]  ;;  %v1711_v45 = vld [vmem:[#allocation10 + $0x14] sm:$0xf0]  ;;  %v1714_v46 = vld [vmem:[#allocation10 + $0x34] sm:$0xf] }
  0x57   : > { %v1610_v47 = vld [vmem:[#allocation10 + $0x38] sm:$0xf0]  ;;  %v1701_v48 = vld [vmem:[#allocation8 + $0x8] sm:$0xff]  ;;  %v1593_v49 = vor.u32 %v1711_v45, %v1592_v44  ;;  %v1712_v51 = vld [vmem:[#allocation10 + $0x24] sm:$0xf]  ;;  %s1305_s4 = scalar_lea.sflag [#allocation15], %s2381_s6 }
  0x58   : > { %791 = vmatpush.bf16.msra.mxu3 %v1625_v16  ;;  %589 = vmatpush.bf16.msra.mxu0 %v1696_v17  ;;  %v1613_v50 = vor.u32 %v1714_v46, %v1610_v47  ;;  %v1602_v52 = vld [vmem:[#allocation10 + $0x28] sm:$0xf0]  ;;  %v1710_v54 = vld [vmem:[#allocation10 + $0x14] sm:$0xf]  ;;  %v1594_v55 = vld [vmem:[#allocation10 + $0x18] sm:$0xf0] }
  0x59   : > { %607 = vmatpush.bf16.msra.mxu1 %v1696_v17  ;;  %682 = vmatpush.bf16.msra.mxu2 %v1704_v25  ;;  %v1605_v53 = vor.u32 %v1712_v51, %v1602_v52  ;;  %v1597_v56 = vor.u32 %v1710_v54, %v1594_v55  ;;  %v1584_v57 = vld [vmem:[#allocation10] sm:$0xf]  ;;  %v1709_v58 = vld [vmem:[#allocation10 + $0x4] sm:$0xf0]  ;;  %v1708_v59 = vld [vmem:[#allocation10 + $0x4] sm:$0xf] }
  0x5a   : > { %v1700_v60 = vld [vmem:[#allocation8] sm:$0xff]  ;;  %v1585_v61 = vor.u32 %v1709_v58, %v1584_v57  ;;  %v1586_v62 = vld [vmem:[#allocation10 + $0x8] sm:$0xf0]  ;;  %s2072_s5 = sshra.s32 %s1336_s14, 4  ;;  %s2078_s21 = scalar_lea.hbm %s2572_s11, 16  ;;  %s2073_s5 = int_to_ptr.hbm [resolvable:$true] %s2072_s5 }
  0x5b   : > { %1548 = vmatmul.msk.bf16.vlgmr.msra.gmra.mxu0 %vm578_vm0, %v550_v26  ;;  %v1589_v63 = vor.u32 %v1708_v59, %v1586_v62  ;;  %v1854_v0 = vld [vmem:[%s2564_s3] ss:$0 sm:$0xff]  ;;  %v1725_v47 = vld [vmem:[#allocation11 + $0x8] sm:$0xff]  ;;  %s2074_s10 = scalar_lea.hbm %s2073_s5, 8  ;;  %p2079_p10 = scmp.lt.s32.totalorder %s2073_s5, %s2572_s11 }
  0x5c   : > { %802 = vmatpush.bf16.msrb.mxu0 %v1645_v20  ;;  %1549 = vmatmul.msk.bf16.vlgmr.msra.gmra.mxu1 %vm578_vm0, %v596_v27  ;;  %p2075_p1 = scmp.ne.s32.totalorder %s2073_s5, %s2074_s10  ;;  %p2080_p11 = scmp.lt.s32.totalorder %s2078_s21, %s2074_s10 }
  0x5d   : > { %792 = vmatpush.bf16.msra.mxu3 %v1617_v28  ;;  %683 = vmatpush.bf16.msra.mxu2 %v1703_v34  ;;  %v817_v28 = vlaneseq }
  0x5e   : > { %p2076_p3 = pnand %p2075_p1, %p2355_p2  ;;  %p2081_p12 = por %p2080_p11, %p2079_p10 }
  0x5f   : > { %v823_v30 = vand.u32 127, %v817_v28 }
  0x60   : > { %803 = vmatpush.bf16.msrb.mxu0 %v1637_v29  ;;  %v818_v29 = vshrl.u32 %v817_v28, 7  ;;  %p2077_p9 = pneg %p2076_p3 }
  0x61   : > { %793 = vmatpush.bf16.msra.mxu3 %v1609_v35  ;;  %684 = vmatpush.bf16.msra.mxu2 %v1702_v41 }
  0x62   : > { %vm824_vm3 = vcmp.gt.s32.totalorder %v823_v30, %v818_v29  ;;  %p2082_p13 = pnand %p2081_p12, %p2077_p9 }
  0x63   : > { %v2435_v33 = vsel %vm824_vm3, -1e+30, %v2201_v32 }
  0x64   : > { %804 = vmatpush.bf16.msrb.mxu0 %v1629_v36 }
  0x65   : > { %794 = vmatpush.bf16.msra.mxu3 %v1601_v42  ;;  %685 = vmatpush.bf16.msra.mxu2 %v1701_v48  ;;  %v1724_v48 = vld [vmem:[#allocation11] sm:$0xff] }
  0x68   : > { %805 = vmatpush.bf16.msrb.mxu0 %v1621_v43 }
  0x69   : > { %795 = vmatpush.bf16.msra.mxu3 %v1593_v49  ;;  %686 = vmatpush.bf16.msra.mxu2 %v1700_v60 }
  0x6c   : > { %806 = vmatpush.bf16.msrb.mxu0 %v1613_v50 }
  0x6d   : > { %796 = vmatpush.bf16.msra.mxu3 %v1585_v61 }
  0x70   : > { %807 = vmatpush.bf16.msrb.mxu0 %v1605_v53 }
  0x74   : > { %808 = vmatpush.bf16.msrb.mxu0 %v1597_v56 }
  0x78   : > { %809 = vmatpush.bf16.msrb.mxu0 %v1589_v63 }
  0xd8   : > { %v591_v1 = vpop.f32.mrf.mxu0 }
  0xd9   : > { %v609_v2 = vpop.f32.mrf.mxu1  ;;  %v592_v3 = vadd.f32 %v1854_v0, %v591_v1 }
  0xda   : > { %v2417_v4 = vadd.f32 %v1854_v0, %v609_v2 }
  0xdb   : > { %v613_v5 = vpack.c.bf16 %v592_v3, %v592_v3 }
  0xdc   : > { %v614_v6 = vpack.c.bf16 %v2417_v4, %v2417_v4 }
  0xdd   : > { %797 = vmatmul.bf16.vlgmr.msra.gmra.mxu3 %v613_v5  ;;  %810 = vmatmul.bf16.vlgmr.msrb.gmra.mxu0 %v613_v5 }
  0xde   : > { %687 = vmatmul.bf16.vlgmr.msra.gmra.mxu2 %v614_v6 }
  0xe0   : > { %v593_v7 = vpop.f32.mrf.mxu0 }
  0xe1   : > { %v611_v8 = vpop.f32.mrf.mxu1 }
 0x15a   : > { %v811_v9 = vpop.f32.mrf.mxu0 }
 0x15b   : > { %v2421_v10 = vpack.c.bf16 %v811_v9, %v811_v9 }
 0x15d   : > { %v878_v18 = vsel %vm876_vm2, %v2421_v10, 0 }
 0x160   : > { %v798_v12 = vpop.f32.mrf.mxu3 }
 0x161   : > { %v688_v11 = vpop.f32.mrf.mxu2  ;;  %v815_v13 = vpack.c.bf16 %v798_v12, %v798_v12 }
 0x162   : > { %v692_v14 = vpack.c.bf16 %v688_v11, %v688_v11  ;;  %v813_v16 = vpop.f32.mrf.mxu0 }
 0x163   : > { %v905_v15 = vunpack.c.l.b16 %v815_v13  ;;  %v831_v17 = vsel %vm826_vm1, %v815_v13, 0  ;;  %v955_v16 = vunpack.c.l.b16 %v2421_v10 }
 0x164   : > { %840 = vmatpush.bf16.xpose.msrb.mxu1 %v831_v17  ;;  %v900_v20 = vunpack.c.l.b16 %v692_v14 }
 0x165   : > { %v906_v19 = vpack.c.b16 %v905_v15, %v905_v15  ;;  %v956_v17 = vpack.c.b16 %v955_v16, %v955_v16 }
 0x166   : > { %v901_v23 = vpack.c.b16 %v900_v20, %v900_v20 }
 0x167   : > { %1043 = vrot.lane.b32.xlu2 %v906_v19, %s2198_s27  ;;  %907 = vrot.lane.b32.xlu1 %v906_v19, %s2199_s15 }
 0x168   : > { %v800_v22 = vpop.f32.mrf.mxu3 }
 0x169   : > { %v690_v21 = vpop.f32.mrf.mxu2 }
 0x16b   : > { %1646 = vmatmul.msk.bf16.vlgmr.msrb.gmra.mxu1 %vm826_vm1, %v692_v14 }
 0x16c   : > { %887 = vmatpush.bf16.msra.mxu1 %v878_v18 }
 0x16f   : > { %1149 = vrot.lane.b32.xlu2 %v906_v19, %s2200_s13  ;;  %902 = vrot.lane.b32.xlu1 %v901_v23, %s2199_s15 }
 0x170   : > { %1033 = vmatpush.bf16.msrb.mxu1 %v1725_v47 }
 0x174   : > { %1034 = vmatpush.bf16.msrb.mxu1 %v1724_v48 }
 0x177   : > { %1147 = vrot.lane.b32.xlu1 %v901_v23, %s2200_s13 }
 0x1c1   : > { %v1044_v24 = vpop.permute.xlu2 %1043 }
 0x1c2   : > { %v1049_v27 = vsel %vm826_vm1, %v1044_v24, 0 }
 0x1c9   : > { %v1150_v49 = vpop.permute.xlu2 %1149 }
 0x1ca   : > { %v1155_v6 = vsel %vm826_vm1, %v1150_v49, 0 }
 0x1d9   : > { %v908_v25 = vpop.permute.xlu1 %907 }
 0x1da   : > { %v913_v26 = vsel %vm826_vm1, %v908_v25, 0 }
 0x1db   : > { %922 = vmatpush.bf16.xpose.msrb.mxu2 %v913_v26 }
 0x1e1   : > { %v903_v31 = vpop.permute.xlu1 %902 }
 0x1e2   : > { %1648 = vmatmul.msk.bf16.vlgmr.msrb.gmra.mxu2 %vm826_vm1, %v903_v31 }
 0x1e3   : > { %1058 = vmatpush.bf16.xpose.msra.mxu2 %v1049_v27 }
 0x1e8   : > { %v842_v34 = vpop.f32.mrf.mxu1 }
 0x1e9   : > { %v843_v35 = vadd.f32 %v842_v34, %v2435_v33  ;;  %v1148_v15 = vpop.permute.xlu1 %1147 }
 0x1eb   : > { %v847_v36 = vsel %vm846_vm4, %v843_v35, -inf }
 0x1ec   : > { %848 = vmax.xlane.f32.xlu0 %v847_v36 }
 0x1f0   : > { %v844_v37 = vpop.f32.mrf.mxu1 }
 0x25f   : > { %v849_v38 = vpop.xlane.xlu0 %848 }
 0x260   : > { %v850_v39 = vsub.f32 %v843_v35, %v849_v38 }
 0x262   : > { %v851_v40 = vmul.f32 1.442695, %v850_v39 }
 0x264   : > { %1858 = vpow2.f32 %v851_v40 }
 0x265   : > { %v924_v41 = vpop.f32.mrf.mxu2 }
 0x266   : > { %v925_v42 = vadd.f32 %v924_v41, %v2435_v33 }
 0x268   : > { %v928_v43 = vsel %vm846_vm4, %v925_v42, -inf }
 0x269   : > { %929 = vmax.xlane.f32.xlu2 %v928_v43 }
 0x26a   : > { %v1859_v44 = vpop.eup %1858 }
 0x26b   : > { %v853_v45 = vsel %vm846_vm4, %v1859_v44, 0.0 }
 0x26c   : > { %854 = vadd.xlane.f32.xlu0 %v853_v45  ;;  %v1727_v45 = vld [vmem:[#allocation11 + $0x18] sm:$0xff] }
 0x26d   : > { %v926_v46 = vpop.f32.mrf.mxu2  ;;  %1005 = vmatpush.bf16.msra.mxu0 %v1727_v45 }
 0x280   : > { %1041 = vrot.lane.b32.xlu0 %v901_v23, %s2198_s27 }
 0x2dc   : > { %v930_v50 = vpop.xlane.xlu2 %929 }
 0x2dd   : > { %v931_v51 = vsub.f32 %v925_v42, %v930_v50 }
 0x2df   : > { %v932_v52 = vmul.f32 1.442695, %v931_v51  ;;  %v855_v53 = vpop.xlane.xlu0 %854 }
 0x2e0   : > { %1860 = vrcp.f32 %v855_v53  ;;  %v867_v59 = vand.u32 2147483648, %v855_v53  ;;  %v865_v61 = vand.u32 2147483647, %v855_v53  ;;  %vm861_vm6 = vweird.f32 %v855_v53 }
 0x2e1   : > { %1862 = vpow2.f32 %v932_v52 }
 0x2e2   : > { %v868_v63 = vor.u32 1.1754944e-38, %v867_v59  ;;  %vm866_vm8 = vcmp.eq.f32.partialorder %v865_v61, 8.507059e+37 }
 0x2e6   : > { %v1861_v54 = vpop.eup %1860 }
 0x2e7   : > { %v2443_v55 = vpop.eup %1862  ;;  %v857_v56 = vmul.f32 %v1861_v54, %v855_v53  ;;  %vm862_vm5 = vweird.f32 %v1861_v54 }
 0x2e8   : > { %v934_v57 = vsel %vm846_vm4, %v2443_v55, 0.0  ;;  %vm863_vm7 = vmor %vm861_vm6, %vm862_vm5 }
 0x2e9   : > { %v858_v58 = vsub.f32 1.0, %v857_v56  ;;  %935 = vadd.xlane.f32.xlu2 %v934_v57 }
 0x2eb   : > { %v859_v60 = vmul.f32 %v1861_v54, %v858_v58 }
 0x2ed   : > { %v860_v62 = vadd.f32 %v1861_v54, %v859_v60 }
 0x2ef   : > { %v864_v0 = vsel %vm863_vm7, %v1861_v54, %v860_v62 }
 0x2f0   : > { %v869_v1 = vsel %vm866_vm8, %v868_v63, %v864_v0 }
 0x2f1   : > { %v2447_v2 = vmul.f32 %v1859_v44, %v869_v1 }
 0x2f2   : > { %v1042_v3 = vpop.permute.xlu0 %1041 }
 0x2f3   : > { %1668 = vmatmul.msk.bf16.vlgmr.msra.gmra.mxu2 %vm826_vm1, %v1042_v3  ;;  %v872_v5 = vpack.c.bf16 %v2447_v2, %v2447_v2 }
 0x2f5   : > { %1647 = vmatmul.msk.bf16.vlgmr.msra.gmra.mxu1 %vm846_vm4, %v872_v5 }
 0x2f6   : > { %1164 = vmatpush.bf16.xpose.msra.mxu1 %v1155_v6 }
 0x35c   : > { %v936_v36 = vpop.xlane.xlu2 %935 }
 0x35d   : > { %v948_v46 = vand.u32 2147483648, %v936_v36  ;;  %vm942_vm10 = vweird.f32 %v936_v36  ;;  %v946_v47 = vand.u32 2147483647, %v936_v36 }
 0x35f   : > { %v949_v51 = vor.u32 1.1754944e-38, %v948_v46  ;;  %vm947_vm12 = vcmp.eq.f32.partialorder %v946_v47, 8.507059e+37  ;;  %v2202_v47 = vmov 128.0  }
 0x372   : > { %v889_v7 = vpop.f32.mrf.mxu1 }
 0x373   : > { %v893_v8 = vpack.c.bf16 %v889_v7, %v889_v7 }
 0x375   : > { %1667 = vmatmul.msk.bf16.vlgmr.msrb.gmra.mxu1 %vm826_vm1, %v893_v8 }
 0x376   : > { %v1060_v9 = vpop.f32.mrf.mxu2 }
 0x377   : > { %v1061_v11 = vadd.f32 %v1060_v9, %v2435_v33 }
 0x379   : > { %v1064_v12 = vsel %vm846_vm4, %v1061_v11, -inf }
 0x37a   : > { %v891_v13 = vpop.f32.mrf.mxu1  ;;  %1065 = vmax.xlane.f32.xlu0 %v1064_v12 }
 0x37e   : > { %v1062_v14 = vpop.f32.mrf.mxu2 }
 0x385   : > { %1679 = vmatmul.msk.bf16.vlgmr.msra.gmra.mxu1 %vm826_vm1, %v1148_v15 }
 0x38e   : > { %1090 = vrot.lane.b32.xlu0 %v956_v17, %s2198_s27 }
 0x3ed   : > { %v1066_v19 = vpop.xlane.xlu0 %1065 }
 0x3ee   : > { %v1067_v21 = vsub.f32 %v1061_v11, %v1066_v19 }
 0x3f0   : > { %v1068_v22 = vmul.f32 1.442695, %v1067_v21 }
 0x3f2   : > { %v2460_v18 = vpop.f32.mrf.mxu1  ;;  %1864 = vpow2.f32 %v1068_v22 }
 0x3f8   : > { %v2464_v26 = vpop.eup %1864 }
 0x3f9   : > { %v1070_v10 = vsel %vm846_vm4, %v2464_v26, 0.0 }
 0x3fa   : > { %v1038_v20 = vpop.f32.mrf.mxu1 }
 0x400   : > { %v1091_v58 = vpop.permute.xlu0 %1090 }
 0x401   : > { %v1096_v1 = vsel %vm876_vm2, %v1091_v58, 0 }
 0x402   : > { %v1166_v23 = vpop.f32.mrf.mxu1 }
 0x403   : > { %v1167_v24 = vadd.f32 %v1166_v23, %v2435_v33  ;;  %v1726_v23 = vld [vmem:[#allocation11 + $0x10] sm:$0xff] }
 0x404   : > { %1006 = vmatpush.bf16.msra.mxu0 %v1726_v23 }
 0x405   : > { %v1170_v25 = vsel %vm846_vm4, %v1167_v24, -inf }
 0x406   : > { %1171 = vmax.xlane.f32.xlu1 %v1170_v25  ;;  %v1729_v25 = vld [vmem:[#allocation11 + $0x28] sm:$0xff] }
 0x408   : > { %1138 = vmatpush.bf16.msrb.mxu0 %v1729_v25 }
 0x40a   : > { %v1168_v27 = vpop.f32.mrf.mxu1 }
 0x40e   : > { %1071 = vadd.xlane.f32.xlu1 %v1070_v10 }
 0x427   : > { %1196 = vrot.lane.b32.xlu1 %v956_v17, %s2200_s13 }
 0x479   : > { %v1172_v28 = vpop.xlane.xlu1 %1171 }
 0x47a   : > { %v1173_v29 = vsub.f32 %v1167_v24, %v1172_v28  ;;  %v1731_v24 = vld [vmem:[#allocation11 + $0x38] sm:$0xff] }
 0x47c   : > { %v1174_v30 = vmul.f32 1.442695, %v1173_v29 }
 0x47e   : > { %1866 = vpow2.f32 %v1174_v30 }
 0x47f   : > { %1868 = vrcp.f32 %v936_v36 }
 0x481   : > { %v1072_v33 = vpop.xlane.xlu1 %1071 }
 0x482   : > { %1870 = vrcp.f32 %v1072_v33  ;;  %v1084_v54 = vand.u32 2147483648, %v1072_v33  ;;  %vm1078_vm14 = vweird.f32 %v1072_v33  ;;  %v1082_v56 = vand.u32 2147483647, %v1072_v33 }
 0x484   : > { %v2469_v31 = vpop.eup %1866  ;;  %v1085_v63 = vor.u32 1.1754944e-38, %v1084_v54  ;;  %vm1083_vm0 = vcmp.eq.f32.partialorder %v1082_v56, 8.507059e+37 }
 0x485   : > { %v1176_v32 = vsel %vm846_vm4, %v2469_v31, 0.0  ;;  %v1869_v37 = vpop.eup %1868 }
 0x486   : > { %1177 = vadd.xlane.f32.xlu2 %v1176_v32  ;;  %v938_v38 = vmul.f32 %v1869_v37, %v936_v36  ;;  %vm943_vm9 = vweird.f32 %v1869_v37 }
 0x487   : > { %vm944_vm11 = vmor %vm942_vm10, %vm943_vm9 }
 0x488   : > { %v1871_v39 = vpop.eup %1870  ;;  %v939_v40 = vsub.f32 1.0, %v938_v38 }
 0x489   : > { %v1074_v41 = vmul.f32 %v1871_v39, %v1072_v33  ;;  %vm1079_vm13 = vweird.f32 %v1871_v39 }
 0x48a   : > { %v940_v42 = vmul.f32 %v1869_v37, %v939_v40  ;;  %vm1080_vm15 = vmor %vm1078_vm14, %vm1079_vm13 }
 0x48b   : > { %v1075_v43 = vsub.f32 1.0, %v1074_v41  ;;  %v1855_v41 = vld [vmem:[%s2568_s7] ss:$0 sm:$0xff] }
 0x48c   : > { %v941_v44 = vadd.f32 %v1869_v37, %v940_v42 }
 0x48d   : > { %v1076_v48 = vmul.f32 %v1871_v39, %v1075_v43 }
 0x48e   : > { %v945_v50 = vsel %vm944_vm11, %v1869_v37, %v941_v44 }
 0x48f   : > { %v1077_v52 = vadd.f32 %v1871_v39, %v1076_v48  ;;  %v950_v53 = vsel %vm947_vm12, %v949_v51, %v945_v50 }
 0x490   : > { %v952_v59 = vmul.f32 %v2443_v55, %v950_v53 }
 0x491   : > { %v1081_v60 = vsel %vm1080_vm15, %v1871_v39, %v1077_v52 }
 0x492   : > { %v1086_v5 = vsel %vm1083_vm0, %v1085_v63, %v1081_v60  ;;  %v953_v7 = vpack.c.bf16 %v952_v59, %v952_v59  ;;  %v1040_v14 = vadd.f32 %v952_v59, %v2447_v2  ;;  %v1730_v2 = vld [vmem:[#allocation11 + $0x30] sm:$0xff] }
 0x493   : > { %v1088_v55 = vmul.f32 %v2464_v26, %v1086_v5  ;;  %v1728_v26 = vld [vmem:[#allocation11 + $0x20] sm:$0xff] }
 0x494   : > { %1139 = vmatpush.bf16.msrb.mxu0 %v1728_v26 }
 0x495   : > { %v1089_v22 = vpack.c.bf16 %v1088_v55, %v1088_v55 }
 0x499   : > { %v1197_v34 = vpop.permute.xlu1 %1196 }
 0x49a   : > { %v1202_v35 = vsel %vm876_vm2, %v1197_v34, 0 }
 0x49b   : > { %1211 = vmatpush.bf16.msrb.mxu2 %v1202_v35 }
 0x49e   : > { %957 = vrot.lane.b32.xlu2 %v956_v17, %s2199_s15  ;;  %v1146_v17 = vadd.f32 %v1088_v55, %v1040_v14 }
 0x4f9   : > { %v1178_v49 = vpop.xlane.xlu2 %1177 }
 0x4fa   : > { %1872 = vrcp.f32 %v1178_v49  ;;  %v1190_v6 = vand.u32 2147483648, %v1178_v49  ;;  %v1188_v9 = vand.u32 2147483647, %v1178_v49  ;;  %vm1184_vm5 = vweird.f32 %v1178_v49 }
 0x4fb   : > { %1874 = vrcp.f32 %v2202_v47 }
 0x4fc   : > { %v1191_v12 = vor.u32 1.1754944e-38, %v1190_v6 }
 0x500   : > { %v1873_v57 = vpop.eup %1872 }
 0x501   : > { %v1180_v61 = vmul.f32 %v1873_v57, %v1178_v49  ;;  %v958_v62 = vpop.permute.xlu2 %957  ;;  %vm1185_vm3 = vweird.f32 %v1873_v57 }
 0x502   : > { %v963_v0 = vsel %vm876_vm2, %v958_v62, 0  ;;  %vm1186_vm6 = vmor %vm1184_vm5, %vm1185_vm3  ;;  %vm1189_vm2 = vcmp.eq.f32.partialorder %v1188_v9, 8.507059e+37 }
 0x503   : > { %v1181_v3 = vsub.f32 1.0, %v1180_v61  ;;  %972 = vmatpush.bf16.msrb.mxu3 %v963_v0 }
 0x505   : > { %v1182_v8 = vmul.f32 %v1873_v57, %v1181_v3 }
 0x506   : > { %1649 = vmatmul.msk.bf16.vlgmr.msrb.gmra.mxu3 %vm846_vm4, %v953_v7 }
 0x507   : > { %1105 = vmatpush.bf16.msra.mxu3 %v1096_v1  ;;  %v1183_v11 = vadd.f32 %v1873_v57, %v1182_v8 }
 0x509   : > { %v1187_v13 = vsel %vm1186_vm6, %v1873_v57, %v1183_v11 }
 0x50a   : > { %v1192_v15 = vsel %vm1189_vm2, %v1191_v12, %v1187_v13 }
 0x50b   : > { %v1194_v16 = vmul.f32 %v2469_v31, %v1192_v15  ;;  %1244 = vmatpush.bf16.msrb.mxu3 %v1731_v24 }
 0x50d   : > { %v1195_v19 = vpack.c.bf16 %v1194_v16, %v1194_v16  ;;  %v1252_v20 = vadd.f32 %v1194_v16, %v1146_v17 }
 0x50f   : > { %1680 = vmatmul.msk.bf16.vlgmr.msrb.gmra.mxu2 %vm846_vm4, %v1195_v19  ;;  %v1297_v21 = vmul.f32 0.25, %v1252_v20  ;;  %1245 = vmatpush.bf16.msrb.mxu3 %v1730_v2 }
 0x511   : > { %1298 = vst.msk [vmem:[%s538_s29] sm:$0xff] %vm846_vm4, %v1297_v21 }
 0x516   : > { %1669 = vmatmul.msk.bf16.vlgmr.msra.gmra.mxu3 %vm846_vm4, %v1089_v22 }
 0x589   : > { %v974_v27 = vpop.f32.mrf.mxu3 }
 0x58a   : > { %v978_v10 = vpack.c.bf16 %v974_v27, %v974_v27 }
 0x58c   : > { %1658 = vmatmul.msk.bf16.vlgmr.msra.gmra.mxu0 %vm826_vm1, %v978_v10 }
 0x591   : > { %v976_v28 = vpop.f32.mrf.mxu3 }
 0x592   : > { %v1213_v29 = vpop.f32.mrf.mxu2 }
 0x593   : > { %v1217_v30 = vpack.c.bf16 %v1213_v29, %v1213_v29 }
 0x595   : > { %1689 = vmatmul.msk.bf16.vlgmr.msrb.gmra.mxu3 %vm826_vm1, %v1217_v30 }
 0x599   : > { %v1107_v31 = vpop.f32.mrf.mxu3 }
 0x59a   : > { %v1111_v32 = vpack.c.bf16 %v1107_v31, %v1107_v31  ;;  %v1215_v33 = vpop.f32.mrf.mxu2 }
 0x59c   : > { %1678 = vmatmul.msk.bf16.vlgmr.msrb.gmra.mxu0 %vm826_vm1, %v1111_v32 }
 0x5a1   : > { %v1109_v34 = vpop.f32.mrf.mxu3 }
 0x609   : > { %v1008_v35 = vpop.f32.mrf.mxu0 }
 0x60a   : > { %v1037_v37 = vadd.f32 %v2460_v18, %v1008_v35  ;;  %v1875_v18 = vpop.eup %1874 }
 0x60b   : > { %v1262_v48 = vmul.f32 128.0, %v1875_v18  ;;  %vm1266_vm1 = vweird.f32 %v1875_v18 }
 0x60d   : > { %v1263_v49 = vsub.f32 1.0, %v1262_v48 }
 0x60f   : > { %v1264_v50 = vmul.f32 %v1875_v18, %v1263_v49 }
 0x611   : > { %v1010_v36 = vpop.f32.mrf.mxu0  ;;  %v1265_v51 = vadd.f32 %v1875_v18, %v1264_v50 }
 0x613   : > { %v1267_v52 = vsel %vm1266_vm1, %v1875_v18, %v1265_v51 }
 0x618   : > { %v1247_v38 = vpop.f32.mrf.mxu3 }
 0x619   : > { %v1141_v39 = vpop.f32.mrf.mxu0 }
 0x61a   : > { %v1145_v40 = vadd.f32 %v1141_v39, %v1037_v37 }
 0x61c   : > { %v1251_v42 = vadd.f32 %v1247_v38, %v1145_v40 }
 0x61e   : > { %v1257_v43 = vadd.f32 %v1855_v41, %v1251_v42 }
 0x620   : > { %v1249_v44 = vpop.f32.mrf.mxu3  ;;  %v1258_v45 = vadd.f32 %v1257_v43, %v2417_v4 }
 0x621   : > { %v1143_v46 = vpop.f32.mrf.mxu0 }
 0x622   : > { %1259 = vadd.xlane.f32.xlu2 %v1258_v45 }
 0x695   : > { %v1260_v53 = vpop.xlane.xlu2 %1259 }
 0x696   : > { %v1268_v54 = vmul.f32 %v1267_v52, %v1260_v53 }
 0x698   : > { %v1269_v56 = vsub.f32 %v1258_v45, %v1268_v54 }
 0x69a   : > { %v1270_v4 = vmul.f32 %v1269_v56, %v1269_v56 }
 0x69c   : > { %1271 = vadd.xlane.f32.xlu0 %v1270_v4 }
 0x69d   : > { %2085 = shalt.err (!%p2082_p13)
}
 0x69e   : > { %1753 = dma.vmem_to_hbm [thread:$0]  (%p2355_p2), %s1334_s26, 128, %s1336_s14, %s1305_s4   ;;  %v1856_v3 = vld [vmem:[%s2569_s8] ss:$0 sm:$0xff] }
 0x69f   : > { %s2601_s2 = sld [smem:[#allocation34_spill]]  ;;  %s531_s14 = scalar_lea.vmem [#allocation13], %s2384_s9 }
 0x6a0   : > { %s2602_s26 = sld [smem:[#allocation33_spill]]  ;;  %s1318_s4 = sshll.u32 %s531_s14, 4  ;;  %s1319_s4 = int_to_ptr.vmem [resolvable:$true] %s1318_s4 }
 0x6a1   : > { %s1300_s20 = scalar_lea.sflag [#allocation4], %s2381_s6 }
 0x6a5   : > { %s1316_s25 = scalar_lea.hbm %s2601_s2, %s1692_s28  ;;  %s2106_s21 = scalar_lea.hbm %s2601_s2, 16 }
 0x6a6   : > { %v1857_v7 = vld [vmem:[%s2602_s26] ss:$0 sm:$0xff]  ;;  %s1320_s5 = sshll.u32 %s1316_s25, 4  ;;  %s1321_s5 = int_to_ptr.hbm [resolvable:$true] %s1320_s5 }
 0x6a7   : > { %s2100_s10 = sshra.s32 %s1321_s5, 4  ;;  %s2101_s10 = int_to_ptr.hbm [resolvable:$true] %s2100_s10 }
 0x6a8   : > { %s2102_s17 = scalar_lea.hbm %s2101_s10, 8  ;;  %p2107_p8 = scmp.lt.s32.totalorder %s2101_s10, %s2601_s2 }
 0x6a9   : > { %p2103_p0 = scmp.ne.s32.totalorder %s2101_s10, %s2102_s17  ;;  %p2108_p1 = scmp.lt.s32.totalorder %s2106_s21, %s2102_s17 }
 0x6ab   : > { %p2104_p4 = pnand %p2103_p0, %p2355_p2  ;;  %p2109_p3 = por %p2108_p1, %p2107_p8 }
 0x6ad   : > { %p2105_p7 = pneg %p2104_p4 }
 0x6af   : > { %p2110_p9 = pnand %p2109_p3, %p2105_p7 }
 0x70f   : > { %v1272_v57 = vpop.xlane.xlu0 %1271 }
 0x710   : > { %v1273_v58 = vmul.f32 %v1272_v57, %v1267_v52 }
 0x712   : > { %v1274_v59 = vadd.f32 1e-05, %v1273_v58 }
 0x714   : > { %1876 = vrsqrt.f32 %v1274_v59  ;;  %vm1281_vm7 = vweird.f32 %v1274_v59 }
 0x71a   : > { %v1877_v60 = vpop.eup %1876 }
 0x71b   : > { %v1276_v61 = vmul.f32 %v1877_v60, %v1274_v59  ;;  %vm1282_vm4 = vweird.f32 %v1877_v60 }
 0x71c   : > { %vm1283_vm8 = vmor %vm1281_vm7, %vm1282_vm4 }
 0x71d   : > { %v1277_v62 = vmul.f32 %v1877_v60, %v1276_v61 }
 0x71f   : > { %v1278_v63 = vmul.f32 0.5, %v1277_v62 }
 0x721   : > { %v1279_v0 = vsub.f32 1.5, %v1278_v63 }
 0x723   : > { %v1280_v1 = vmul.f32 %v1877_v60, %v1279_v0 }
 0x725   : > { %v1284_v5 = vsel %vm1283_vm8, %v1877_v60, %v1280_v1 }
 0x726   : > { %v1285_v6 = vmul.f32 %v1284_v5, %v1269_v56 }
 0x728   : > { %v1290_v8 = vmul.f32 %v1856_v3, %v1285_v6 }
 0x72a   : > { %v1295_v9 = vadd.f32 %v1857_v7, %v1290_v8 }
 0x72c   : > { %1296 = vst [vmem:[%s531_s14] sm:$0xff] %v1295_v9 }
 0x72d   : > { %2113 = shalt.err (!%p2110_p9)
}
 0x72e   : > { %1752 = dma.vmem_to_hbm [thread:$0]  (%p2355_p2), %s1319_s4, 128, %s1321_s5, %s1300_s20  }
 0x72f PF: > { %s2603_s6 = sld [smem:[#allocation23_spill]]  ;;  %p1777_p10 = pnand %p1518_p6, %p2362_p5 }
 0x731   : > { %p1778_p11 = pneg %p1777_p10 }
 0x735   : > { %s1347_s15 = sand.u32 1, %s2603_s6  }
 0x736   : > { %s1348_s13 = scalar_lea.sflag [#allocation4], %s1347_s15 }
 0x737   : > { %2159 = dma.done.wait (%p1778_p11), %s1348_s13, 128  }
 0x738   : > { %2161 = vsyncadd (%p1778_p11), %s1348_s13, 4294967168  ;;  %s1358_s29 = scalar_lea.sflag [#allocation15], %s1347_s15 }
 0x739   : > { %2163 = dma.done.wait (%p1778_p11), %s1358_s29, 128  }
 0x73a   : > { %2165 = vsyncadd (%p1778_p11), %s1358_s29, 4294967168  ;;  %s36_s22 = sadd.s32 1, %s2188_s22   ;;  %s2605_s16 = sld [smem:[#allocation24_spill]] }
 0x73b   : > { %p33_p12 = scmp.ge.s32.totalorder %s36_s22, 4   ;;  %s2606_s19 = sld [smem:[#allocation27_spill]] }
 0x73c   : > { %s2607_s20 = sld [smem:[#allocation25_spill]]  ;;  %s2609_s17 = smov %s2172_s18 }
 0x73d   : > { %s2608_s21 = sld [smem:[#allocation26_spill]]  ;;  %35 = sbr.rel (!%p33_p12) target bundleno = 19 (0x13), region = 154 }
 0x740   : > { %s2610_s18 = smov %s2605_s16 }
 0x742   :  { %1364 = vsyncpa [#allocation3], 1 }
 0x743   :  { %1366 = vsyncpa [#allocation3 + $0x1], 1 }
 0x744   :  { %1367 = vsyncpa [#allocation6], 1 }
 0x745   :  { %1369 = vsyncpa [#allocation6 + $0x1], 1 }
 0x746   :  { %1370 = vsyncpa [#allocation9], 1 }
 0x747   :  { %1371 = vsyncpa [#allocation12], 1 }
 0x748   :  { %1372 = vsyncpa [#allocation4], 1 }
 0x749   :  { %1374 = vsyncpa [#allocation4 + $0x1], 1 }
 0x74a   :  { %1375 = vsyncpa [#allocation15], 1 }
 0x74b   :  { %1377 = vsyncpa [#allocation15 + $0x1], 1 }

</bundles_post_ra>
